<compile_context>
chip_gen: v7x
topology: tpu7x:2x2x1
jax: 0.10.0
libtpu: 0.0.40
codegen_flags: <defaults>
</compile_context>

<pallas_src>
import math

import jax
import jax.numpy as jnp
import numpy as np
from jax.experimental import pallas as pl
from jax.experimental.pallas import tpu as pltpu

# ----------------- small, module-consistent configuration -----------------
B, S = 2, 3            # batch, s_x.size(1)
H = W = 8              # spatial size, N = H*W
C = 32                 # dim
NH = 8                 # num_heads
HD = C // NH           # head dim = 4
SR = 2                 # sr_ratio (>1: forward unconditionally uses self.sr_kv / self.sr)
N = H * W              # 64
HS, WS = H // SR, W // SR
NN = HS * WS           # new_N = 16
K = C * SR * SR        # 128  (patchified conv contraction)
SN = S * NN            # 48   (all support frames stacked)
HN = NH * NN           # 128  (all heads' key/value rows, block-diagonal packing)
SCALE = HD ** (-0.5)
EPS = 1e-5             # nn.LayerNorm default


# ------------------------------ Pallas kernel -------------------------------
def cross_attn_kernel(pq_ref, psx_ref, wck_ref, bck_ref, gkv_ref, bekv_ref,
                      wkT_ref, wvT_ref, wcs_ref, bcs_ref, gsr_ref, besr_ref,
                      wqT_ref, wpT_ref, bp_ref, rep_ref, mbd_ref, gseg_ref,
                      mup_ref, out_ref):
    """One grid step == one batch element.  All S frames and all heads are handled
    with a handful of full-lane-width matmuls."""
    f32 = jnp.float32

    # ---- k/v branch: sr_kv conv (patchify matmul) -> LayerNorm -> Wk / Wv ----
    xkv = jnp.dot(pq_ref[...], wck_ref[...], preferred_element_type=f32) + bck_ref[...]   # (NN, C)
    mu = jnp.mean(xkv, axis=-1, keepdims=True)
    var = jnp.mean((xkv - mu) ** 2, axis=-1, keepdims=True)
    xn = (xkv - mu) * jax.lax.rsqrt(var + EPS) * gkv_ref[...] + bekv_ref[...]
    k = jnp.dot(xn, wkT_ref[...], preferred_element_type=f32)                             # (NN, C)
    v = jnp.dot(xn, wvT_ref[...], preferred_element_type=f32)                             # (NN, C)

    # Block-diagonal head packing: row r of the (HN, C) buffers holds token (r % NN),
    # masked to the channels of head (r // NN).  Built with one MXU replication matmul
    # + one VPU mask multiply (no per-head slices, no transposes, no relayouts).
    rep = rep_ref[...]            # (HN, NN)  replication matrix
    mbd = mbd_ref[...]            # (HN, C)   block-diagonal head mask
    k_bd = jnp.dot(rep, k, preferred_element_type=f32) * mbd                              # (HN, C)
    v_bd = jnp.dot(rep, v, preferred_element_type=f32) * mbd                              # (HN, C)

    # ---- q branch, all S support frames at once: sr conv -> LayerNorm -> q ----
    xs = jnp.dot(psx_ref[...], wcs_ref[...], preferred_element_type=f32) + bcs_ref[...]   # (SN, C)
    mu = jnp.mean(xs, axis=-1, keepdims=True)
    var = jnp.mean((xs - mu) ** 2, axis=-1, keepdims=True)
    xns = (xs - mu) * jax.lax.rsqrt(var + EPS) * gsr_ref[...] + besr_ref[...]
    q = jnp.dot(xns, wqT_ref[...], preferred_element_type=f32)                            # (SN, C)

    # ---- attention: all heads x all frames in 3 lane-dense matmuls ----
    # scores[i, h*NN+m] = <q_h[i], k_h[m]>  via contraction against the block-diagonal K.
    scores = jax.lax.dot_general(q, k_bd, (((1,), (1,)), ((), ())),
                                 preferred_element_type=f32) * SCALE                      # (SN, HN)
    # Subtracting the row max (over ALL heads) is a per-head-constant shift, so the
    # per-head softmax is unchanged and numerically safe for these score magnitudes.
    scores = scores - jnp.max(scores, axis=-1, keepdims=True)
    p = jnp.exp(scores)
    # Per-head (16-lane-group) sums, broadcast back to every lane of the group, via MXU.
    denom = jnp.dot(p, gseg_ref[...], preferred_element_type=f32)                         # (SN, HN)
    p = p * pl.reciprocal(denom, approx=True)
    o = jnp.dot(p, v_bd, preferred_element_type=f32)                                      # (SN, C)

    # ---- mean over S (1/S folded into wpT on the host) -> proj -> bilinear upsample ----
    o_sum = o[0:NN]
    for s in range(1, S):
        o_sum = o_sum + o[s * NN:(s + 1) * NN]                                            # (NN, C)
    pr = jnp.dot(o_sum, wpT_ref[...], preferred_element_type=f32) + bp_ref[...]           # (NN, C)
    out_ref[...] = jnp.dot(mup_ref[...], pr, preferred_element_type=f32)                  # (N, C)


# ------------------------------ JAX glue -----------------------------------
def extract_patches(tok, sr):
    """tok: (B, Ntok, C) row-major over (H, W) -> (B, new_N, C*sr*sr), flattened
    in (c_in, kh, kw) order (matches Conv2d weight.reshape(C_out, -1))."""
    b, _, c = tok.shape
    img = tok.transpose(0, 2, 1).reshape(b, c, H, W)                         # NCHW
    p = img.reshape(b, c, H // sr, sr, W // sr, sr)
    p = p.transpose(0, 2, 4, 1, 3, 5)                                        # (B,h,w,C,sr,sr)
    return p.reshape(b, (H // sr) * (W // sr), c * sr * sr)


def interp_matrix(out_size, in_size):
    """1-D bilinear interpolation matrix, align_corners=True (PyTorch semantics)."""
    if in_size == 1:
        return np.ones((out_size, 1), np.float32)
    m = np.zeros((out_size, in_size), np.float32)
    scale = (in_size - 1) / (out_size - 1)
    for i in range(out_size):
        sp = i * scale
        j0 = min(int(np.floor(sp)), in_size - 1)
        frac = sp - j0
        m[i, j0] += 1.0 - frac
        if frac > 0.0 and j0 + 1 < in_size:
            m[i, j0 + 1] += frac
    return m


M_UP = np.kron(interp_matrix(H, HS), interp_matrix(W, WS)).astype(np.float32)  # (N, NN)

# Host-side constant matrices for the block-diagonal head packing / segment softmax.
_head_of_row = np.arange(HN) // NN                                              # (HN,)
_head_of_col = np.arange(C) // HD                                               # (C,)
REP_M = np.tile(np.eye(NN, dtype=np.float32), (NH, 1))                          # (HN, NN)
MASK_BD = (_head_of_row[:, None] == _head_of_col[None, :]).astype(np.float32)   # (HN, C)
G_SEG = (_head_of_row[:, None] == _head_of_row[None, :]).astype(np.float32)     # (HN, HN)


def my_cross_attention(query, prior_mask, s_x, params):
    del prior_mask  # unused in the reference forward
    f32 = jnp.float32

    # patchified conv inputs
    patches_q = extract_patches(query, SR)                                   # (B, NN, K)
    patches_sx = jnp.stack(
        [extract_patches(s_x[:, st], SR) for st in range(S)], axis=1)        # (B, S, NN, K)
    patches_sx = patches_sx.reshape(B, SN, K)                                # (B, S*NN, K)

    # flatten conv weights to (K, C); split kv weight; fold 1/S mean into proj weight.
    wck = params["w_conv_kv"].reshape(C, K).T.astype(f32)
    wcs = params["w_conv_sr"].reshape(C, K).T.astype(f32)
    wkT = params["w_kv"][:C, :].T.astype(f32)                                # (C, C)
    wvT = params["w_kv"][C:, :].T.astype(f32)                                # (C, C)
    wqT = params["w_q"].T.astype(f32)                                        # (C, C)
    wpT = (params["w_proj"].T / S).astype(f32)                               # (C, C), 1/S folded
    row = lambda v: v.reshape(1, C).astype(f32)

    full = lambda shape: pl.BlockSpec(shape, lambda b: tuple(0 for _ in shape))

    out = pl.pallas_call(
        cross_attn_kernel,
        out_shape=jax.ShapeDtypeStruct((B, N, C), f32),
        grid=(B,),
        in_specs=[
            pl.BlockSpec((None, NN, K), lambda b: (b, 0, 0)),   # patches_q
            pl.BlockSpec((None, SN, K), lambda b: (b, 0, 0)),   # patches_sx (all S frames)
            full((K, C)),                                       # w_conv_kv (flattened)
            full((1, C)),                                       # b_conv_kv
            full((1, C)),                                       # LN_kv gamma
            full((1, C)),                                       # LN_kv beta
            full((C, C)),                                       # Wk^T
            full((C, C)),                                       # Wv^T
            full((K, C)),                                       # w_conv_sr (flattened)
            full((1, C)),                                       # b_conv_sr
            full((1, C)),                                       # LN_sr gamma
            full((1, C)),                                       # LN_sr beta
            full((C, C)),                                       # Wq^T
            full((C, C)),                                       # Wproj^T / S
            full((1, C)),                                       # b_proj
            full((HN, NN)),                                     # REP
            full((HN, C)),                                      # block-diag head mask
            full((HN, HN)),                                     # per-head segment-sum matrix
            full((N, NN)),                                      # bilinear upsample matrix
        ],
        out_specs=pl.BlockSpec((None, N, C), lambda b: (b, 0, 0)),
        compiler_params=pltpu.CompilerParams(dimension_semantics=("parallel",)),
    )(patches_q, patches_sx, wck, row(params["b_conv_kv"]), row(params["g_kv"]),
      row(params["be_kv"]), wkT, wvT, wcs, row(params["b_conv_sr"]),
      row(params["g_sr"]), row(params["be_sr"]), wqT, wpT, row(params["b_proj"]),
      jnp.asarray(REP_M), jnp.asarray(MASK_BD), jnp.asarray(G_SEG), jnp.asarray(M_UP))
    return out


# --------------------------- pure-JAX reference -----------------------------
def _layernorm(x, g, b):
    mu = jnp.mean(x, axis=-1, keepdims=True)
    var = jnp.mean((x - mu) ** 2, axis=-1, keepdims=True)
    return (x - mu) / jnp.sqrt(var + EPS) * g + b


def reference(query, s_x, p):
    dn = ("NCHW", "OIHW", "NCHW")
    img_q = query.transpose(0, 2, 1).reshape(B, C, H, W)
    nq = jax.lax.conv_general_dilated(img_q, p["w_conv_kv"], (SR, SR), "VALID",
                                      dimension_numbers=dn)
    nq = nq + p["b_conv_kv"][None, :, None, None]
    nq = nq.reshape(B, C, NN).transpose(0, 2, 1)
    nq = _layernorm(nq, p["g_kv"], p["be_kv"])
    kv = nq @ p["w_kv"].T
    k = kv[..., :C].reshape(B, NN, NH, HD).transpose(0, 2, 1, 3)
    v = kv[..., C:].reshape(B, NN, NH, HD).transpose(0, 2, 1, 3)
    outs = []
    for st in range(S):
        x_ = s_x[:, st].transpose(0, 2, 1).reshape(B, C, H, W)
        x_ = jax.lax.conv_general_dilated(x_, p["w_conv_sr"], (SR, SR), "VALID",
                                          dimension_numbers=dn)
        x_ = x_ + p["b_conv_sr"][None, :, None, None]
        x_ = x_.reshape(B, C, NN).transpose(0, 2, 1)
        x_ = _layernorm(x_, p["g_sr"], p["be_sr"])
        q = (x_ @ p["w_q"].T).reshape(B, NN, NH, HD).transpose(0, 2, 1, 3)
        attn = jnp.einsum("bhnd,bhmd->bhnm", q, k) * SCALE
        attn = jax.nn.softmax(attn, axis=-1)
        o = jnp.einsum("bhnm,bhmd->bhnd", attn, v).transpose(0, 2, 1, 3).reshape(B, NN, C)
        o = o @ p["w_proj"].T + p["b_proj"]
        up = jnp.einsum("Nm,bmc->bNc", jnp.asarray(M_UP), o)                 # bilinear, a_c=True
        outs.append(up)
    return jnp.mean(jnp.stack(outs, axis=1), axis=1)


# --------------------------------- main -------------------------------------
if __name__ == "__main__":
    key = jax.random.PRNGKey(0)
    ks = jax.random.split(key, 16)
    f32 = jnp.float32
    # Deterministic synthetic parameters (non-zero biases/affines to exercise the math).
    conv_std = math.sqrt(2.0 / (SR * SR * C))
    params = {
        "w_conv_kv": jax.random.normal(ks[0], (C, C, SR, SR), f32) * conv_std,
        "b_conv_kv": jax.random.normal(ks[1], (C,), f32) * 0.02,
        "g_kv": 1.0 + 0.1 * jax.random.normal(ks[2], (C,), f32),
        "be_kv": 0.02 * jax.random.normal(ks[3], (C,), f32),
        "w_conv_sr": jax.random.normal(ks[4], (C, C, SR, SR), f32) * conv_std,
        "b_conv_sr": jax.random.normal(ks[5], (C,), f32) * 0.02,
        "g_sr": 1.0 + 0.1 * jax.random.normal(ks[6], (C,), f32),
        "be_sr": 0.02 * jax.random.normal(ks[7], (C,), f32),
        "w_kv": jax.random.normal(ks[8], (2 * C, C), f32) * 0.02,
        "w_q": jax.random.normal(ks[9], (C, C), f32) * 0.02,
        "w_proj": jax.random.normal(ks[10], (C, C), f32) * 0.02,
        "b_proj": jax.random.normal(ks[11], (C,), f32) * 0.02,
    }

    query = jax.random.normal(ks[12], (B, N, C), f32)
    s_x = jax.random.normal(ks[13], (B, S, N, C), f32)
    prior_mask = jax.random.normal(ks[14], (B, 1, H, W), f32)  # unused by forward

    out = my_cross_attention(query, prior_mask, s_x, params)
    out = jax.block_until_ready(out)

    ref = reference(query, s_x, params)
    assert out.shape == (B, N, C)
    np.testing.assert_allclose(np.asarray(out), np.asarray(ref), rtol=2e-4, atol=2e-4)
    print("KERNEL_OK")
</pallas_src>

<mosaic_0001>
module attributes {stable_mosaic.version = 11 : i64} {
  func.func @cross_attn_kernel(%arg0: i32, %arg1: memref<1x16x128xf32, #tpu.memory_space<vmem>>, %arg2: memref<1x48x128xf32, #tpu.memory_space<vmem>>, %arg3: memref<128x32xf32, #tpu.memory_space<vmem>>, %arg4: memref<1x32xf32, #tpu.memory_space<vmem>>, %arg5: memref<1x32xf32, #tpu.memory_space<vmem>>, %arg6: memref<1x32xf32, #tpu.memory_space<vmem>>, %arg7: memref<32x32xf32, #tpu.memory_space<vmem>>, %arg8: memref<32x32xf32, #tpu.memory_space<vmem>>, %arg9: memref<128x32xf32, #tpu.memory_space<vmem>>, %arg10: memref<1x32xf32, #tpu.memory_space<vmem>>, %arg11: memref<1x32xf32, #tpu.memory_space<vmem>>, %arg12: memref<1x32xf32, #tpu.memory_space<vmem>>, %arg13: memref<32x32xf32, #tpu.memory_space<vmem>>, %arg14: memref<32x32xf32, #tpu.memory_space<vmem>>, %arg15: memref<1x32xf32, #tpu.memory_space<vmem>>, %arg16: memref<128x16xf32, #tpu.memory_space<vmem>>, %arg17: memref<128x32xf32, #tpu.memory_space<vmem>>, %arg18: memref<128x128xf32, #tpu.memory_space<vmem>>, %arg19: memref<64x16xf32, #tpu.memory_space<vmem>>, %arg20: memref<1x64x32xf32, #tpu.memory_space<vmem>>) attributes {dimension_semantics = [#tpu.dimension_semantics<parallel>], iteration_bounds = array<i64: 2>, scalar_prefetch = 0 : i64, scratch_operands = 0 : i64, tpu.core_type = #tpu.core_type<tc>, window_params = [{transform_indices = @transform_0, window_bounds = array<i64: 1, 16, 128>}, {transform_indices = @transform_1, window_bounds = array<i64: 1, 48, 128>}, {pipeline_mode = #tpu.pipeline_mode<synchronous>, transform_indices = @transform_2, window_bounds = array<i64: 128, 32>}, {pipeline_mode = #tpu.pipeline_mode<synchronous>, transform_indices = @transform_3, window_bounds = array<i64: 1, 32>}, {pipeline_mode = #tpu.pipeline_mode<synchronous>, transform_indices = @transform_4, window_bounds = array<i64: 1, 32>}, {pipeline_mode = #tpu.pipeline_mode<synchronous>, transform_indices = @transform_5, window_bounds = array<i64: 1, 32>}, {pipeline_mode = #tpu.pipeline_mode<synchronous>, transform_indices = @transform_6, window_bounds = array<i64: 32, 32>}, {pipeline_mode = #tpu.pipeline_mode<synchronous>, transform_indices = @transform_7, window_bounds = array<i64: 32, 32>}, {pipeline_mode = #tpu.pipeline_mode<synchronous>, transform_indices = @transform_8, window_bounds = array<i64: 128, 32>}, {pipeline_mode = #tpu.pipeline_mode<synchronous>, transform_indices = @transform_9, window_bounds = array<i64: 1, 32>}, {pipeline_mode = #tpu.pipeline_mode<synchronous>, transform_indices = @transform_10, window_bounds = array<i64: 1, 32>}, {pipeline_mode = #tpu.pipeline_mode<synchronous>, transform_indices = @transform_11, window_bounds = array<i64: 1, 32>}, {pipeline_mode = #tpu.pipeline_mode<synchronous>, transform_indices = @transform_12, window_bounds = array<i64: 32, 32>}, {pipeline_mode = #tpu.pipeline_mode<synchronous>, transform_indices = @transform_13, window_bounds = array<i64: 32, 32>}, {pipeline_mode = #tpu.pipeline_mode<synchronous>, transform_indices = @transform_14, window_bounds = array<i64: 1, 32>}, {pipeline_mode = #tpu.pipeline_mode<synchronous>, transform_indices = @transform_15, window_bounds = array<i64: 128, 16>}, {pipeline_mode = #tpu.pipeline_mode<synchronous>, transform_indices = @transform_16, window_bounds = array<i64: 128, 32>}, {pipeline_mode = #tpu.pipeline_mode<synchronous>, transform_indices = @transform_17, window_bounds = array<i64: 128, 128>}, {pipeline_mode = #tpu.pipeline_mode<synchronous>, transform_indices = @transform_18, window_bounds = array<i64: 64, 16>}, {transform_indices = @transform_19, window_bounds = array<i64: 1, 64, 32>}]} {
    %c0 = arith.constant 0 : index
    %c0_0 = arith.constant 0 : index
    %c0_1 = arith.constant 0 : index
    %0 = vector.load %arg1[%c0, %c0_0, %c0_1] : memref<1x16x128xf32, #tpu.memory_space<vmem>>, vector<1x16x128xf32>
    %1 = vector.shape_cast %0 : vector<1x16x128xf32> to vector<16x128xf32>
    %c0_2 = arith.constant 0 : index
    %c0_3 = arith.constant 0 : index
    %2 = vector.load %arg3[%c0_2, %c0_3] : memref<128x32xf32, #tpu.memory_space<vmem>>, vector<128x32xf32>
    %cst = arith.constant dense<0.000000e+00> : vector<16x32xf32>
    %3 = tpu.matmul %1, %2, %cst {dimension_numbers = #tpu.dot_dimension_numbers<[1], [0], [0], [1], [0, 0, 1, 1], [], []>} : vector<16x128xf32>, vector<128x32xf32>, vector<16x32xf32> -> vector<16x32xf32>
    %c0_4 = arith.constant 0 : index
    %c0_5 = arith.constant 0 : index
    %4 = vector.load %arg4[%c0_4, %c0_5] : memref<1x32xf32, #tpu.memory_space<vmem>>, vector<1x32xf32>
    %5 = vector.broadcast %4 : vector<1x32xf32> to vector<16x32xf32>
    %6 = arith.addf %3, %5 : vector<16x32xf32>
    %cst_6 = arith.constant dense<0.000000e+00> : vector<16xf32>
    %7 = vector.multi_reduction <add>, %6, %cst_6 [1] : vector<16x32xf32> to vector<16xf32>
    %8 = vector.shape_cast %7 : vector<16xf32> to vector<16x1xf32>
    %cst_7 = arith.constant 3.200000e+01 : f32
    %9 = vector.broadcast %cst_7 : f32 to vector<16x1xf32>
    %10 = arith.divf %8, %9 : vector<16x1xf32>
    %11 = vector.broadcast %10 : vector<16x1xf32> to vector<16x32xf32>
    %12 = arith.subf %6, %11 : vector<16x32xf32>
    %13 = arith.mulf %12, %12 : vector<16x32xf32>
    %cst_8 = arith.constant dense<0.000000e+00> : vector<16xf32>
    %14 = vector.multi_reduction <add>, %13, %cst_8 [1] : vector<16x32xf32> to vector<16xf32>
    %15 = vector.shape_cast %14 : vector<16xf32> to vector<16x1xf32>
    %cst_9 = arith.constant 3.200000e+01 : f32
    %16 = vector.broadcast %cst_9 : f32 to vector<16x1xf32>
    %17 = arith.divf %15, %16 : vector<16x1xf32>
    %18 = vector.broadcast %10 : vector<16x1xf32> to vector<16x32xf32>
    %19 = arith.subf %6, %18 : vector<16x32xf32>
    %cst_10 = arith.constant 9.99999974E-6 : f32
    %20 = vector.broadcast %cst_10 : f32 to vector<16x1xf32>
    %21 = arith.addf %17, %20 : vector<16x1xf32>
    %22 = math.rsqrt %21 : vector<16x1xf32>
    %23 = vector.broadcast %22 : vector<16x1xf32> to vector<16x32xf32>
    %24 = arith.mulf %19, %23 : vector<16x32xf32>
    %c0_11 = arith.constant 0 : index
    %c0_12 = arith.constant 0 : index
    %25 = vector.load %arg5[%c0_11, %c0_12] : memref<1x32xf32, #tpu.memory_space<vmem>>, vector<1x32xf32>
    %26 = vector.broadcast %25 : vector<1x32xf32> to vector<16x32xf32>
    %27 = arith.mulf %24, %26 : vector<16x32xf32>
    %c0_13 = arith.constant 0 : index
    %c0_14 = arith.constant 0 : index
    %28 = vector.load %arg6[%c0_13, %c0_14] : memref<1x32xf32, #tpu.memory_space<vmem>>, vector<1x32xf32>
    %29 = vector.broadcast %28 : vector<1x32xf32> to vector<16x32xf32>
    %30 = arith.addf %27, %29 : vector<16x32xf32>
    %c0_15 = arith.constant 0 : index
    %c0_16 = arith.constant 0 : index
    %31 = vector.load %arg7[%c0_15, %c0_16] : memref<32x32xf32, #tpu.memory_space<vmem>>, vector<32x32xf32>
    %cst_17 = arith.constant dense<0.000000e+00> : vector<16x32xf32>
    %32 = tpu.matmul %30, %31, %cst_17 {dimension_numbers = #tpu.dot_dimension_numbers<[1], [0], [0], [1], [0, 0, 1, 1], [], []>} : vector<16x32xf32>, vector<32x32xf32>, vector<16x32xf32> -> vector<16x32xf32>
    %c0_18 = arith.constant 0 : index
    %c0_19 = arith.constant 0 : index
    %33 = vector.load %arg8[%c0_18, %c0_19] : memref<32x32xf32, #tpu.memory_space<vmem>>, vector<32x32xf32>
    %cst_20 = arith.constant dense<0.000000e+00> : vector<16x32xf32>
    %34 = tpu.matmul %30, %33, %cst_20 {dimension_numbers = #tpu.dot_dimension_numbers<[1], [0], [0], [1], [0, 0, 1, 1], [], []>} : vector<16x32xf32>, vector<32x32xf32>, vector<16x32xf32> -> vector<16x32xf32>
    %c0_21 = arith.constant 0 : index
    %c0_22 = arith.constant 0 : index
    %35 = vector.load %arg16[%c0_21, %c0_22] : memref<128x16xf32, #tpu.memory_space<vmem>>, vector<128x16xf32>
    %c0_23 = arith.constant 0 : index
    %c0_24 = arith.constant 0 : index
    %36 = vector.load %arg17[%c0_23, %c0_24] : memref<128x32xf32, #tpu.memory_space<vmem>>, vector<128x32xf32>
    %cst_25 = arith.constant dense<0.000000e+00> : vector<128x32xf32>
    %37 = tpu.matmul %35, %32, %cst_25 {dimension_numbers = #tpu.dot_dimension_numbers<[1], [0], [0], [1], [0, 0, 1, 1], [], []>} : vector<128x16xf32>, vector<16x32xf32>, vector<128x32xf32> -> vector<128x32xf32>
    %38 = arith.mulf %37, %36 : vector<128x32xf32>
    %cst_26 = arith.constant dense<0.000000e+00> : vector<128x32xf32>
    %39 = tpu.matmul %35, %34, %cst_26 {dimension_numbers = #tpu.dot_dimension_numbers<[1], [0], [0], [1], [0, 0, 1, 1], [], []>} : vector<128x16xf32>, vector<16x32xf32>, vector<128x32xf32> -> vector<128x32xf32>
    %40 = arith.mulf %39, %36 : vector<128x32xf32>
    %c0_27 = arith.constant 0 : index
    %c0_28 = arith.constant 0 : index
    %c0_29 = arith.constant 0 : index
    %41 = vector.load %arg2[%c0_27, %c0_28, %c0_29] : memref<1x48x128xf32, #tpu.memory_space<vmem>>, vector<1x48x128xf32>
    %42 = vector.shape_cast %41 : vector<1x48x128xf32> to vector<48x128xf32>
    %c0_30 = arith.constant 0 : index
    %c0_31 = arith.constant 0 : index
    %43 = vector.load %arg9[%c0_30, %c0_31] : memref<128x32xf32, #tpu.memory_space<vmem>>, vector<128x32xf32>
    %cst_32 = arith.constant dense<0.000000e+00> : vector<48x32xf32>
    %44 = tpu.matmul %42, %43, %cst_32 {dimension_numbers = #tpu.dot_dimension_numbers<[1], [0], [0], [1], [0, 0, 1, 1], [], []>} : vector<48x128xf32>, vector<128x32xf32>, vector<48x32xf32> -> vector<48x32xf32>
    %c0_33 = arith.constant 0 : index
    %c0_34 = arith.constant 0 : index
    %45 = vector.load %arg10[%c0_33, %c0_34] : memref<1x32xf32, #tpu.memory_space<vmem>>, vector<1x32xf32>
    %46 = vector.broadcast %45 : vector<1x32xf32> to vector<48x32xf32>
    %47 = arith.addf %44, %46 : vector<48x32xf32>
    %cst_35 = arith.constant dense<0.000000e+00> : vector<48xf32>
    %48 = vector.multi_reduction <add>, %47, %cst_35 [1] : vector<48x32xf32> to vector<48xf32>
    %49 = vector.shape_cast %48 : vector<48xf32> to vector<48x1xf32>
    %cst_36 = arith.constant 3.200000e+01 : f32
    %50 = vector.broadcast %cst_36 : f32 to vector<48x1xf32>
    %51 = arith.divf %49, %50 : vector<48x1xf32>
    %52 = vector.broadcast %51 : vector<48x1xf32> to vector<48x32xf32>
    %53 = arith.subf %47, %52 : vector<48x32xf32>
    %54 = arith.mulf %53, %53 : vector<48x32xf32>
    %cst_37 = arith.constant dense<0.000000e+00> : vector<48xf32>
    %55 = vector.multi_reduction <add>, %54, %cst_37 [1] : vector<48x32xf32> to vector<48xf32>
    %56 = vector.shape_cast %55 : vector<48xf32> to vector<48x1xf32>
    %cst_38 = arith.constant 3.200000e+01 : f32
    %57 = vector.broadcast %cst_38 : f32 to vector<48x1xf32>
    %58 = arith.divf %56, %57 : vector<48x1xf32>
    %59 = vector.broadcast %51 : vector<48x1xf32> to vector<48x32xf32>
    %60 = arith.subf %47, %59 : vector<48x32xf32>
    %cst_39 = arith.constant 9.99999974E-6 : f32
    %61 = vector.broadcast %cst_39 : f32 to vector<48x1xf32>
    %62 = arith.addf %58, %61 : vector<48x1xf32>
    %63 = math.rsqrt %62 : vector<48x1xf32>
    %64 = vector.broadcast %63 : vector<48x1xf32> to vector<48x32xf32>
    %65 = arith.mulf %60, %64 : vector<48x32xf32>
    %c0_40 = arith.constant 0 : index
    %c0_41 = arith.constant 0 : index
    %66 = vector.load %arg11[%c0_40, %c0_41] : memref<1x32xf32, #tpu.memory_space<vmem>>, vector<1x32xf32>
    %67 = vector.broadcast %66 : vector<1x32xf32> to vector<48x32xf32>
    %68 = arith.mulf %65, %67 : vector<48x32xf32>
    %c0_42 = arith.constant 0 : index
    %c0_43 = arith.constant 0 : index
    %69 = vector.load %arg12[%c0_42, %c0_43] : memref<1x32xf32, #tpu.memory_space<vmem>>, vector<1x32xf32>
    %70 = vector.broadcast %69 : vector<1x32xf32> to vector<48x32xf32>
    %71 = arith.addf %68, %70 : vector<48x32xf32>
    %c0_44 = arith.constant 0 : index
    %c0_45 = arith.constant 0 : index
    %72 = vector.load %arg13[%c0_44, %c0_45] : memref<32x32xf32, #tpu.memory_space<vmem>>, vector<32x32xf32>
    %cst_46 = arith.constant dense<0.000000e+00> : vector<48x32xf32>
    %73 = tpu.matmul %71, %72, %cst_46 {dimension_numbers = #tpu.dot_dimension_numbers<[1], [0], [0], [1], [0, 0, 1, 1], [], []>} : vector<48x32xf32>, vector<32x32xf32>, vector<48x32xf32> -> vector<48x32xf32>
    %cst_47 = arith.constant dense<0.000000e+00> : vector<48x128xf32>
    %74 = tpu.matmul %73, %38, %cst_47 {dimension_numbers = #tpu.dot_dimension_numbers<[1], [1], [0], [0], [0, 0, 1, 0], [], []>} : vector<48x32xf32>, vector<128x32xf32>, vector<48x128xf32> -> vector<48x128xf32>
    %cst_48 = arith.constant 5.000000e-01 : f32
    %75 = vector.broadcast %cst_48 : f32 to vector<48x128xf32>
    %76 = arith.mulf %74, %75 : vector<48x128xf32>
    %cst_49 = arith.constant dense<0xFF800000> : vector<48xf32>
    %77 = vector.multi_reduction <maximumf>, %76, %cst_49 [1] : vector<48x128xf32> to vector<48xf32>
    %78 = vector.shape_cast %77 : vector<48xf32> to vector<48x1xf32>
    %79 = vector.broadcast %78 : vector<48x1xf32> to vector<48x128xf32>
    %80 = arith.subf %76, %79 : vector<48x128xf32>
    %81 = math.exp %80 : vector<48x128xf32>
    %c0_50 = arith.constant 0 : index
    %c0_51 = arith.constant 0 : index
    %82 = vector.load %arg18[%c0_50, %c0_51] : memref<128x128xf32, #tpu.memory_space<vmem>>, vector<128x128xf32>
    %cst_52 = arith.constant dense<0.000000e+00> : vector<48x128xf32>
    %83 = tpu.matmul %81, %82, %cst_52 {dimension_numbers = #tpu.dot_dimension_numbers<[1], [0], [0], [1], [0, 0, 1, 1], [], []>} : vector<48x128xf32>, vector<128x128xf32>, vector<48x128xf32> -> vector<48x128xf32>
    %84 = tpu.reciprocal %83 {approx = true} : vector<48x128xf32> -> vector<48x128xf32>
    %85 = arith.mulf %81, %84 : vector<48x128xf32>
    %cst_53 = arith.constant dense<0.000000e+00> : vector<48x32xf32>
    %86 = tpu.matmul %85, %40, %cst_53 {dimension_numbers = #tpu.dot_dimension_numbers<[1], [0], [0], [1], [0, 0, 1, 1], [], []>} : vector<48x128xf32>, vector<128x32xf32>, vector<48x32xf32> -> vector<48x32xf32>
    %87 = vector.extract_strided_slice %86 {offsets = [0, 0], sizes = [16, 32], strides = [1, 1]} : vector<48x32xf32> to vector<16x32xf32>
    %88 = vector.extract_strided_slice %86 {offsets = [16, 0], sizes = [16, 32], strides = [1, 1]} : vector<48x32xf32> to vector<16x32xf32>
    %89 = arith.addf %87, %88 : vector<16x32xf32>
    %90 = vector.extract_strided_slice %86 {offsets = [32, 0], sizes = [16, 32], strides = [1, 1]} : vector<48x32xf32> to vector<16x32xf32>
    %91 = arith.addf %89, %90 : vector<16x32xf32>
    %c0_54 = arith.constant 0 : index
    %c0_55 = arith.constant 0 : index
    %92 = vector.load %arg14[%c0_54, %c0_55] : memref<32x32xf32, #tpu.memory_space<vmem>>, vector<32x32xf32>
    %cst_56 = arith.constant dense<0.000000e+00> : vector<16x32xf32>
    %93 = tpu.matmul %91, %92, %cst_56 {dimension_numbers = #tpu.dot_dimension_numbers<[1], [0], [0], [1], [0, 0, 1, 1], [], []>} : vector<16x32xf32>, vector<32x32xf32>, vector<16x32xf32> -> vector<16x32xf32>
    %c0_57 = arith.constant 0 : index
    %c0_58 = arith.constant 0 : index
    %94 = vector.load %arg15[%c0_57, %c0_58] : memref<1x32xf32, #tpu.memory_space<vmem>>, vector<1x32xf32>
    %95 = vector.broadcast %94 : vector<1x32xf32> to vector<16x32xf32>
    %96 = arith.addf %93, %95 : vector<16x32xf32>
    %c0_59 = arith.constant 0 : index
    %c0_60 = arith.constant 0 : index
    %97 = vector.load %arg19[%c0_59, %c0_60] : memref<64x16xf32, #tpu.memory_space<vmem>>, vector<64x16xf32>
    %cst_61 = arith.constant dense<0.000000e+00> : vector<64x32xf32>
    %98 = tpu.matmul %97, %96, %cst_61 {dimension_numbers = #tpu.dot_dimension_numbers<[1], [0], [0], [1], [0, 0, 1, 1], [], []>} : vector<64x16xf32>, vector<16x32xf32>, vector<64x32xf32> -> vector<64x32xf32>
    %c0_62 = arith.constant 0 : index
    %c0_63 = arith.constant 0 : index
    %c0_64 = arith.constant 0 : index
    %99 = vector.load %arg20[%c0_62, %c0_63, %c0_64] : memref<1x64x32xf32, #tpu.memory_space<vmem>>, vector<1x64x32xf32>
    %100 = vector.shape_cast %99 : vector<1x64x32xf32> to vector<64x32xf32>
    %101 = vector.shape_cast %98 : vector<64x32xf32> to vector<1x64x32xf32>
    tpu.vector_store %arg20[%c0_62, %c0_63, %c0_64], %101 {strides = array<i32>} : memref<1x64x32xf32, #tpu.memory_space<vmem>>, vector<1x64x32xf32>,
    return
  }
  func.func @transform_0(%arg0: i32) -> (i32, i32, i32) {
    %c0_i32 = arith.constant 0 : i32
    %c0_i32_0 = arith.constant 0 : i32
    %c0_i32_1 = arith.constant 0 : i32
    return %arg0, %c0_i32, %c0_i32_0 : i32, i32, i32
  }
  func.func @transform_1(%arg0: i32) -> (i32, i32, i32) {
    %c0_i32 = arith.constant 0 : i32
    %c0_i32_0 = arith.constant 0 : i32
    %c0_i32_1 = arith.constant 0 : i32
    return %arg0, %c0_i32, %c0_i32_0 : i32, i32, i32
  }
  func.func @transform_2(%arg0: i32) -> (i32, i32) {
    %c0_i32 = arith.constant 0 : i32
    %c0_i32_0 = arith.constant 0 : i32
    %c0_i32_1 = arith.constant 0 : i32
    return %c0_i32, %c0_i32_0 : i32, i32
  }
  func.func @transform_3(%arg0: i32) -> (i32, i32) {
    %c0_i32 = arith.constant 0 : i32
    %c0_i32_0 = arith.constant 0 : i32
    %c0_i32_1 = arith.constant 0 : i32
    return %c0_i32, %c0_i32_0 : i32, i32
  }
  func.func @transform_4(%arg0: i32) -> (i32, i32) {
    %c0_i32 = arith.constant 0 : i32
    %c0_i32_0 = arith.constant 0 : i32
    %c0_i32_1 = arith.constant 0 : i32
    return %c0_i32, %c0_i32_0 : i32, i32
  }
  func.func @transform_5(%arg0: i32) -> (i32, i32) {
    %c0_i32 = arith.constant 0 : i32
    %c0_i32_0 = arith.constant 0 : i32
    %c0_i32_1 = arith.constant 0 : i32
    return %c0_i32, %c0_i32_0 : i32, i32
  }
  func.func @transform_6(%arg0: i32) -> (i32, i32) {
    %c0_i32 = arith.constant 0 : i32
    %c0_i32_0 = arith.constant 0 : i32
    %c0_i32_1 = arith.constant 0 : i32
    return %c0_i32, %c0_i32_0 : i32, i32
  }
  func.func @transform_7(%arg0: i32) -> (i32, i32) {
    %c0_i32 = arith.constant 0 : i32
    %c0_i32_0 = arith.constant 0 : i32
    %c0_i32_1 = arith.constant 0 : i32
    return %c0_i32, %c0_i32_0 : i32, i32
  }
  func.func @transform_8(%arg0: i32) -> (i32, i32) {
    %c0_i32 = arith.constant 0 : i32
    %c0_i32_0 = arith.constant 0 : i32
    %c0_i32_1 = arith.constant 0 : i32
    return %c0_i32, %c0_i32_0 : i32, i32
  }
  func.func @transform_9(%arg0: i32) -> (i32, i32) {
    %c0_i32 = arith.constant 0 : i32
    %c0_i32_0 = arith.constant 0 : i32
    %c0_i32_1 = arith.constant 0 : i32
    return %c0_i32, %c0_i32_0 : i32, i32
  }
  func.func @transform_10(%arg0: i32) -> (i32, i32) {
    %c0_i32 = arith.constant 0 : i32
    %c0_i32_0 = arith.constant 0 : i32
    %c0_i32_1 = arith.constant 0 : i32
    return %c0_i32, %c0_i32_0 : i32, i32
  }
  func.func @transform_11(%arg0: i32) -> (i32, i32) {
    %c0_i32 = arith.constant 0 : i32
    %c0_i32_0 = arith.constant 0 : i32
    %c0_i32_1 = arith.constant 0 : i32
    return %c0_i32, %c0_i32_0 : i32, i32
  }
  func.func @transform_12(%arg0: i32) -> (i32, i32) {
    %c0_i32 = arith.constant 0 : i32
    %c0_i32_0 = arith.constant 0 : i32
    %c0_i32_1 = arith.constant 0 : i32
    return %c0_i32, %c0_i32_0 : i32, i32
  }
  func.func @transform_13(%arg0: i32) -> (i32, i32) {
    %c0_i32 = arith.constant 0 : i32
    %c0_i32_0 = arith.constant 0 : i32
    %c0_i32_1 = arith.constant 0 : i32
    return %c0_i32, %c0_i32_0 : i32, i32
  }
  func.func @transform_14(%arg0: i32) -> (i32, i32) {
    %c0_i32 = arith.constant 0 : i32
    %c0_i32_0 = arith.constant 0 : i32
    %c0_i32_1 = arith.constant 0 : i32
    return %c0_i32, %c0_i32_0 : i32, i32
  }
  func.func @transform_15(%arg0: i32) -> (i32, i32) {
    %c0_i32 = arith.constant 0 : i32
    %c0_i32_0 = arith.constant 0 : i32
    %c0_i32_1 = arith.constant 0 : i32
    return %c0_i32, %c0_i32_0 : i32, i32
  }
  func.func @transform_16(%arg0: i32) -> (i32, i32) {
    %c0_i32 = arith.constant 0 : i32
    %c0_i32_0 = arith.constant 0 : i32
    %c0_i32_1 = arith.constant 0 : i32
    return %c0_i32, %c0_i32_0 : i32, i32
  }
  func.func @transform_17(%arg0: i32) -> (i32, i32) {
    %c0_i32 = arith.constant 0 : i32
    %c0_i32_0 = arith.constant 0 : i32
    %c0_i32_1 = arith.constant 0 : i32
    return %c0_i32, %c0_i32_0 : i32, i32
  }
  func.func @transform_18(%arg0: i32) -> (i32, i32) {
    %c0_i32 = arith.constant 0 : i32
    %c0_i32_0 = arith.constant 0 : i32
    %c0_i32_1 = arith.constant 0 : i32
    return %c0_i32, %c0_i32_0 : i32, i32
  }
  func.func @transform_19(%arg0: i32) -> (i32, i32, i32) {
    %c0_i32 = arith.constant 0 : i32
    %c0_i32_0 = arith.constant 0 : i32
    %c0_i32_1 = arith.constant 0 : i32
    return %arg0, %c0_i32, %c0_i32_0 : i32, i32, i32
  }
}

</mosaic_0001>

<bundles_post_ra>
// kernel: tpu_custom_call.1
= control target key start
LH: loop header
LB: loop body
LE: loop exit
PB: predicated region body
PF: predicated region fallthrough
CT: control target
= control target key end

     0   :  { %s3989_s0 = inlined_call_operand.vmem [shape: f32[2,16,128], index: 0, kind: input, shape index: {}]   ;;  %s3990_s1 = inlined_call_operand.vmem [shape: f32[2,48,128], index: 1, kind: input, shape index: {}]   ;;  %s3991_s2 = inlined_call_operand.vmem [shape: f32[128,32], index: 2, kind: input, shape index: {}]   ;;  %s3992_s3 = inlined_call_operand.vmem [shape: f32[1,32], index: 3, kind: input, shape index: {}]   ;;  %s3993_s4 = inlined_call_operand.vmem [shape: f32[1,32], index: 4, kind: input, shape index: {}]   ;;  %s3994_s5 = inlined_call_operand.vmem [shape: f32[1,32], index: 5, kind: input, shape index: {}]   ;;  %s3995_s6 = inlined_call_operand.vmem [shape: f32[32,32], index: 6, kind: input, shape index: {}]   ;;  %s3996_s7 = inlined_call_operand.vmem [shape: f32[32,32], index: 7, kind: input, shape index: {}]   ;;  %s3997_s8 = inlined_call_operand.vmem [shape: f32[128,32], index: 8, kind: input, shape index: {}]   ;;  %s3998_s9 = inlined_call_operand.vmem [shape: f32[1,32], index: 9, kind: input, shape index: {}]   ;;  %s3999_s10 = inlined_call_operand.vmem [shape: f32[1,32], index: 10, kind: input, shape index: {}]   ;;  %s4000_s11 = inlined_call_operand.vmem [shape: f32[1,32], index: 11, kind: input, shape index: {}]   ;;  %s4001_s12 = inlined_call_operand.vmem [shape: f32[32,32], index: 12, kind: input, shape index: {}]   ;;  %s4002_s13 = inlined_call_operand.vmem [shape: f32[32,32], index: 13, kind: input, shape index: {}]   ;;  %s4003_s14 = inlined_call_operand.vmem [shape: f32[1,32], index: 14, kind: input, shape index: {}]   ;;  %s4004_s15 = inlined_call_operand.vmem [shape: f32[128,16], index: 15, kind: input, shape index: {}]   ;;  %s4005_s16 = inlined_call_operand.vmem [shape: f32[128,32], index: 16, kind: input, shape index: {}]   ;;  %s4006_s17 = inlined_call_operand.vmem [shape: f32[128,128], index: 17, kind: input, shape index: {}]   ;;  %s4007_s18 = inlined_call_operand.vmem [shape: f32[64,16], index: 18, kind: input, shape index: {}]   ;;  %s4008_s19 = inlined_call_operand.vmem [shape: f32[2,64,32], index: 19, kind: output, shape index: {}]  }
   0x1   :  { %4010 = sst [smem:[#allocation2_spill]] %s3989_s0  ;;  %s3381_s0 = smov 0  }
   0x2   :  { %4011 = sst [smem:[#allocation3_spill]] %s3990_s1 }
   0x3   :  { %4012 = sst [smem:[#allocation4_spill]] %s3991_s2 }
   0x4   :  { %4013 = sst [smem:[#allocation5_spill]] %s3992_s3 }
   0x5 LB: > { %s2404_s30 = sadd.s32 4294967295, %s3279_s0   ;;  %p2408_p0 = scmp.ge.s32.totalorder %s3279_s0, 1  ;;  %s3279_s0 = sphi %s3381_s0, %s29_s0  }
   0x6   : > { %p547_p1 = scmp.lt.s32.totalorder %s3279_s0, 3 }
   0x8   : > { %p548_p2 = pnand %p2408_p0, %p547_p1 }
   0x9   : > { %s4014_s1 = sld [smem:[#allocation4_spill]] (!%p548_p2)  ;;  %p608_p3 = scmp.lt.s32.totalorder (!%p548_p2), %s2404_s30, 1  ;;  %vm723_vm0 = vcmask (!%p548_p2), 261120   ;;  %v769_v43 = vld [vmem:[%s3995_s6] sm:$0xff] (!%p548_p2)  ;;  %v770_v44 = vld [vmem:[%s3995_s6 + $0x8] sm:$0xff] (!%p548_p2)  ;;  %v771_v45 = vld [vmem:[%s3995_s6 + $0x10] sm:$0xff] (!%p548_p2) }
   0xa   : > { %551 = sbr.rel (%p548_p2) target bundleno = 2853 (0xb25), region = 96  ;;  %s4015_s2 = sld [smem:[#allocation2_spill]] (!%p548_p2)  ;;  %v3032_v46 = vpack.c.bf16 (!%p548_p2), %v770_v44, %v769_v43  ;;  %v772_v47 = vld [vmem:[%s3995_s6 + $0x18] sm:$0xff] (!%p548_p2)  ;;  %v854_v49 = vld [vmem:[%s3996_s7] sm:$0xff] (!%p548_p2)  ;;  %v855_v50 = vld [vmem:[%s3996_s7 + $0x8] sm:$0xff] (!%p548_p2)  ;;  %vm965_vm1 = vcmask (!%p548_p2), 130048  }
   0xb   : > { %s4016_s24 = sld [smem:[#allocation5_spill]] (!%p548_p2)  ;;  %v3036_v48 = vpack.c.bf16 (!%p548_p2), %v772_v47, %v771_v45  ;;  %v3040_v51 = vpack.c.bf16 (!%p548_p2), %v855_v50, %v854_v49  ;;  %v2415_v59 = vld [vmem:[%s3993_s4] ss:$0 sm:$0xff] (!%p548_p2)  ;;  %v1355_v43 = vld [vmem:[%s3997_s8 + $0x68] sm:$0xff] (!%p548_p2)  ;;  %v944_v44 = vld [vmem:[%s4004_s15 + $0x58] sm:$0xff] (!%p548_p2)  ;;  %s4017_s25 = sld [smem:[#allocation3_spill]] (!%p548_p2) }
   0xc   : > { %3033 = vmatprep.subr.bf16.mxu1 (!%p548_p2), %v3032_v46  ;;  %v2416_v61 = vld [vmem:[%s3994_s5] ss:$0 sm:$0xff] (!%p548_p2)  ;;  %v1356_v47 = vld [vmem:[%s3997_s8 + $0x70] sm:$0xff] (!%p548_p2)  ;;  %v946_v49 = vld [vmem:[%s4004_s15 + $0x68] sm:$0xff] (!%p548_p2) }
   0xd   : > { %3035 = vmatpush3.bf16.msra.mxu1 (!%p548_p2), %v3032_v46  ;;  %v945_v45 = vld [vmem:[%s4004_s15 + $0x60] sm:$0xff] (!%p548_p2)  ;;  %v947_v50 = vld [vmem:[%s4004_s15 + $0x70] sm:$0xff] (!%p548_p2)  ;;  %vm3644_vm2 = vmpackc.low (!%p548_p2), %vm723_vm0, %vm723_vm0 }
   0xe   : > { %3037 = vmatprep.subr.bf16.mxu1 (!%p548_p2), %v3036_v48 }
   0xf   : > { %v625_v0 = vld [vmem:[%s4014_s1] sm:$0xff] (!%p548_p2)  ;;  %v626_v1 = vld [vmem:[%s4014_s1 + $0x8] sm:$0xff] (!%p548_p2)  ;;  %v627_v2 = vld [vmem:[%s4014_s1 + $0x10] sm:$0xff] (!%p548_p2) }
  0x10   : > { %v3000_v3 = vpack.c.bf16 (!%p548_p2), %v626_v1, %v625_v0  ;;  %v628_v4 = vld [vmem:[%s4014_s1 + $0x18] sm:$0xff] (!%p548_p2)  ;;  %v629_v6 = vld [vmem:[%s4014_s1 + $0x20] sm:$0xff] (!%p548_p2)  ;;  %v630_v7 = vld [vmem:[%s4014_s1 + $0x28] sm:$0xff] (!%p548_p2) }
  0x11   : > { %v3004_v5 = vpack.c.bf16 %v628_v4, %v627_v2  ;;  %s4021_s30 = smov (!%p608_p3, %s2404_s30), 1  ;;  %v3008_v8 = vpack.c.bf16 %v630_v7, %v629_v6  ;;  %v631_v9 = vld [vmem:[%s4014_s1 + $0x30] sm:$0xff]  ;;  %v632_v10 = vld [vmem:[%s4014_s1 + $0x38] sm:$0xff]  ;;  %v633_v13 = vld [vmem:[%s4014_s1 + $0x40] sm:$0xff]  ;;  %3039 = vmatpush3.bf16.msra.mxu1 %v3036_v48 }
  0x12   : > { %3001 = vmatprep.subr.bf16.mxu0 %v3000_v3  ;;  %s2497_s20 = sshll.u32 %s4021_s30, 4  ;;  %v3012_v12 = vpack.c.bf16 %v632_v10, %v631_v9  ;;  %v634_v14 = vld [vmem:[%s4014_s1 + $0x48] sm:$0xff]  ;;  %v635_v16 = vld [vmem:[%s4014_s1 + $0x50] sm:$0xff]  ;;  %v636_v17 = vld [vmem:[%s4014_s1 + $0x58] sm:$0xff]  ;;  %3041 = vmatprep.subr.bf16.mxu1 %v3040_v51  ;;  %s3224_s3 = smul.u32 48, %s4021_s30 }
  0x13   : > { %3003 = vmatpush3.bf16.msra.mxu0 %v3000_v3  ;;  %s3413_s23 = scalar_lea.vmem %s4015_s2, %s2497_s20  ;;  %v3016_v15 = vpack.c.bf16 %v634_v14, %v633_v13  ;;  %v3020_v18 = vpack.c.bf16 %v636_v17, %v635_v16  ;;  %v637_v19 = vld [vmem:[%s4014_s1 + $0x60] sm:$0xff]  ;;  %v638_v20 = vld [vmem:[%s4014_s1 + $0x68] sm:$0xff]  ;;  %v639_v22 = vld [vmem:[%s4014_s1 + $0x70] sm:$0xff] }
  0x14   : > { %3005 = vmatprep.subr.bf16.mxu0 %v3004_v5  ;;  %v623_v11 = vld [vmem:[%s3413_s23] sm:$0xff]  ;;  %v3024_v21 = vpack.c.bf16 %v638_v20, %v637_v19  ;;  %v640_v23 = vld [vmem:[%s4014_s1 + $0x78] sm:$0xff]  ;;  %v624_v25 = vld [vmem:[%s3413_s23 + $0x8] sm:$0xff]  ;;  %s617_s26 = scalar_lea.vmem %s4017_s25, %s3224_s3  ;;  %s2498_s25 = sshll.u32 %s4021_s30, 6 }
  0x15   : > { %2711 = vmatprep.mubr.f32.mxu0 %v623_v11  ;;  %v3028_v24 = vpack.c.bf16 %v640_v23, %v639_v22  ;;  %v2414_v26 = vld [vmem:[%s4016_s24] ss:$0 sm:$0xff]  ;;  %v856_v2 = vld [vmem:[%s3996_s7 + $0x10] sm:$0xff]  ;;  %v857_v3 = vld [vmem:[%s3996_s7 + $0x18] sm:$0xff]  ;;  %s622_s28 = scalar_lea.vmem %s4008_s19, %s2498_s25 }
  0x16   : > { %v3044_v6 = vpack.c.bf16 %v857_v3, %v856_v2  ;;  %v933_v7 = vld [vmem:[%s4004_s15] sm:$0xff]  ;;  %v1343_v9 = vld [vmem:[%s3997_s8 + $0x8] sm:$0xff]  ;;  %v1344_v14 = vld [vmem:[%s3997_s8 + $0x10] sm:$0xff] }
  0x17   : > { %3007 = vmatpush3.bf16.msra.mxu0 %v3004_v5  ;;  %v934_v16 = vld [vmem:[%s4004_s15 + $0x8] sm:$0xff]  ;;  %v935_v17 = vld [vmem:[%s4004_s15 + $0x10] sm:$0xff]  ;;  %v1346_v19 = vld [vmem:[%s3997_s8 + $0x20] sm:$0xff] }
  0x18   : > { %3009 = vmatprep.subr.bf16.mxu0 %v3008_v8  ;;  %v1347_v20 = vld [vmem:[%s3997_s8 + $0x28] sm:$0xff]  ;;  %v936_v23 = vld [vmem:[%s4004_s15 + $0x18] sm:$0xff]  ;;  %v3640_v2 = vld [vmem:[%s4005_s16 + $0x10] sm:$0xff] }
  0x19   : > { %v1357_v48 = vld [vmem:[%s3997_s8 + $0x78] sm:$0xff] }
  0x1b   : > { %3011 = vmatpush3.bf16.msra.mxu0 %v3008_v8  ;;  %v1342_v8 = vld [vmem:[%s3997_s8] sm:$0xff] }
  0x1c   : > { %3013 = vmatprep.subr.bf16.mxu0 %v3012_v12  ;;  %v3056_v13 = vpack.c.bf16 %v1343_v9, %v1342_v8  ;;  %v3655_v9 = vld [vmem:[%s4005_s16 + $0x28] sm:$0xff] }
  0x1f   : > { %3015 = vmatpush3.bf16.msra.mxu0 %v3012_v12 }
  0x20   : > { %3017 = vmatprep.subr.bf16.mxu0 %v3016_v15 }
  0x23   : > { %3019 = vmatpush3.bf16.msra.mxu0 %v3016_v15  ;;  %v1345_v15 = vld [vmem:[%s3997_s8 + $0x18] sm:$0xff] }
  0x24   : > { %3021 = vmatprep.subr.bf16.mxu0 %v3020_v18 }
  0x27   : > { %3023 = vmatpush3.bf16.msra.mxu0 %v3020_v18  ;;  %v3060_v18 = vpack.c.bf16 %v1345_v15, %v1344_v14 }
  0x28   : > { %3025 = vmatprep.subr.bf16.mxu0 %v3024_v21 }
  0x2b   : > { %3027 = vmatpush3.bf16.msra.mxu0 %v3024_v21 }
  0x2c   : > { %3029 = vmatprep.subr.bf16.mxu0 %v3028_v24 }
  0x2f   : > { %3031 = vmatpush3.bf16.msra.mxu0 %v3028_v24 }
  0x32   : > { %2712 = vmatmul.mubr.f32.vlgmr.msra.gmra.mrb[0].mxu0 %v624_v25  ;;  %v3064_v25 = vpack.c.bf16 %v1347_v20, %v1346_v19 }
  0x33   : > { %2768 = vmatprep.mubr.msk.f32.mxu0 %vm965_vm1, %v933_v7 }
 0x105   : > { %v2713_v27 = vpop.f32.mrb[0].mxu0 }
 0x106   : > { %v714_v28 = vpop.f32.mrb[1].mxu0  ;;  %v720_v30 = vadd.f32 %v2713_v27, %v2414_v26  ;;  %v1348_v27 = vld [vmem:[%s3997_s8 + $0x30] sm:$0xff] }
 0x107   : > { %v715_v29 = vadd.f32 %v2414_v26, %v714_v28  ;;  %v937_v26 = vld [vmem:[%s4004_s15 + $0x20] sm:$0xff]  ;;  %v1349_v28 = vld [vmem:[%s3997_s8 + $0x38] sm:$0xff] }
 0x108   : > { %v727_v32 = vsel %vm723_vm0, %v720_v30, 0.0 }
 0x109   : > { %v724_v31 = vsel %vm723_vm0, %v715_v29, 0.0 }
 0x10a   : > { %725 = vadd.xlane.f32.xlu0 %v724_v31  ;;  %v3068_v31 = vpack.c.bf16 %v1349_v28, %v1348_v27 }
 0x10e   : > { %728 = vadd.xlane.f32.xlu0 %v727_v32  ;;  %v1350_v32 = vld [vmem:[%s3997_s8 + $0x40] sm:$0xff] }
 0x197   : > { %v726_v33 = vpop.xlane.xlu0 %725 }
 0x198   : > { %v731_v34 = vmul.f32 0.03125, %v726_v33  ;;  %v1351_v33 = vld [vmem:[%s3997_s8 + $0x48] sm:$0xff] }
 0x19a   : > { %v733_v35 = vsub.f32 %v715_v29, %v731_v34  ;;  %v938_v29 = vld [vmem:[%s4004_s15 + $0x28] sm:$0xff]  ;;  %v940_v34 = vld [vmem:[%s4004_s15 + $0x38] sm:$0xff] }
 0x19b   : > { %v729_v36 = vpop.xlane.xlu0 %728 }
 0x19c   : > { %v732_v37 = vmul.f32 0.03125, %v729_v36  ;;  %v735_v38 = vmul.f32 %v733_v35, %v733_v35  ;;  %v3072_v36 = vpack.c.bf16 %v1351_v33, %v1350_v32 }
 0x19e   : > { %v734_v39 = vsub.f32 %v720_v30, %v732_v37  ;;  %v737_v40 = vsel %vm723_vm0, %v735_v38, 0.0  ;;  %v939_v30 = vld [vmem:[%s4004_s15 + $0x30] sm:$0xff]  ;;  %v1353_v38 = vld [vmem:[%s3997_s8 + $0x58] sm:$0xff] }
 0x19f   : > { %738 = vadd.xlane.f32.xlu1 %v737_v40  ;;  %v1352_v37 = vld [vmem:[%s3997_s8 + $0x50] sm:$0xff] }
 0x1a0   : > { %v736_v41 = vmul.f32 %v734_v39, %v734_v39  ;;  %v943_v40 = vld [vmem:[%s4004_s15 + $0x50] sm:$0xff] }
 0x1a2   : > { %v740_v42 = vsel %vm723_vm0, %v736_v41, 0.0  ;;  %v3076_v41 = vpack.c.bf16 %v1353_v38, %v1352_v37  ;;  %v3711_v37 = vld [vmem:[%s4005_s16 + $0x68] sm:$0xff]  ;;  %v3718_v38 = vld [vmem:[%s4005_s16 + $0x60] sm:$0xff] }
 0x1a3   : > { %741 = vadd.xlane.f32.xlu1 %v740_v42  ;;  %v1354_v42 = vld [vmem:[%s3997_s8 + $0x60] sm:$0xff] }
 0x1a4   : > { %v3080_v46 = vpack.c.bf16 %v1355_v43, %v1354_v42 }
 0x22c   : > { %v739_v52 = vpop.xlane.xlu1 %738 }
 0x22d   : > { %v743_v53 = vmul.f32 0.03125, %v739_v52  ;;  %v948_v52 = vld [vmem:[%s4004_s15 + $0x78] sm:$0xff] }
 0x22f   : > { %v745_v54 = vadd.f32 1e-05, %v743_v53  ;;  %v1336_v53 = vld [vmem:[%s617_s26] sm:$0xff] }
 0x230   : > { %v742_v55 = vpop.xlane.xlu1 %741 }
 0x231   : > { %3233 = vrsqrt.f32 %v745_v54  ;;  %v744_v56 = vmul.f32 0.03125, %v742_v55  ;;  %v1337_v54 = vld [vmem:[%s617_s26 + $0x8] sm:$0xff]  ;;  %v1338_v55 = vld [vmem:[%s617_s26 + $0x10] sm:$0xff] }
 0x233   : > { %v746_v57 = vadd.f32 1e-05, %v744_v56  ;;  %v1339_v56 = vld [vmem:[%s617_s26 + $0x18] sm:$0xff] }
 0x235   : > { %3235 = vrsqrt.f32 %v746_v57  ;;  %v1340_v57 = vld [vmem:[%s617_s26 + $0x20] sm:$0xff] }
 0x23b   : > { %v3234_v58 = vpop.eup %3233 }
 0x23c   : > { %v749_v60 = vmul.f32 %v3234_v58, %v733_v35  ;;  %v941_v35 = vld [vmem:[%s4004_s15 + $0x40] sm:$0xff]  ;;  %v1341_v58 = vld [vmem:[%s617_s26 + $0x28] sm:$0xff] }
 0x23e   : > { %v758_v62 = vmul.f32 %v2415_v59, %v749_v60  ;;  %v3628_v60 = vld [vmem:[%s4005_s16] sm:$0xff] }
 0x23f   : > { %v3236_v63 = vpop.eup %3235 }
 0x240   : > { %v750_v0 = vmul.f32 %v3236_v63, %v734_v39  ;;  %v767_v1 = vadd.f32 %v2416_v61, %v758_v62  ;;  %v942_v39 = vld [vmem:[%s4004_s15 + $0x48] sm:$0xff] }
 0x242   : > { %v759_v4 = vmul.f32 %v2415_v59, %v750_v0  ;;  %2722 = vmatprep.mubr.msk.f32.mxu1 %vm723_vm0, %v767_v1  ;;  %v3623_v59 = vld [vmem:[%s4005_s16 + $0x8] sm:$0xff] }
 0x244   : > { %v768_v5 = vadd.f32 %v2416_v61, %v759_v4 }
 0x246   : > { %2723 = vmatmul.mubr.msk.f32.vlgmr.msra.gmra.mrb[0].mxu1 %vm723_vm0, %v768_v5 }
 0x247   : > { %3043 = vmatpush3.bf16.msra.mxu1 %v3040_v51  ;;  %2733 = vmatprep.mubr.msk.f32.mxu1 %vm723_vm0, %v767_v1  ;;  %v3084_v51 = vpack.c.bf16 %v1357_v48, %v1356_v47  ;;  %v3635_v1 = vld [vmem:[%s4005_s16 + $0x18] sm:$0xff] }
 0x248   : > { %3045 = vmatprep.subr.bf16.mxu1 %v3044_v6 }
 0x24b   : > { %3047 = vmatpush3.bf16.msra.mxu1 %v3044_v6 }
 0x24e   : > { %2734 = vmatmul.mubr.msk.f32.vlgmr.msra.gmra.mrb[2].mxu1 %vm723_vm0, %v768_v5 }
 0x24f   : > { %2740 = vmatprep.mubr.msk.f32.mxu1 %vm965_vm1, %v933_v7 }
 0x319   : > { %v2724_v10 = vpop.f32.mrb[0].mxu1 }
 0x31a   : > { %v845_v11 = vpop.f32.mrb[1].mxu1 }
 0x31b   : > { %v3048_v12 = vpack.c.bf16 %v2724_v10, %v845_v11  ;;  %v3662_v10 = vld [vmem:[%s4005_s16 + $0x20] sm:$0xff] }
 0x31d   : > { %3049 = vmatprep.subr.bf16.mxu1 %v3048_v12 }
 0x31e   : > { %3051 = vmatpush3.bf16.msra.mxu1 %v3048_v12 }
 0x31f   : > { %3057 = vmatprep.subr.bf16.mxu1 %v3056_v13 }
 0x321   : > { %v2735_v21 = vpop.f32.mrb[2].mxu1  ;;  %2741 = vmatmul.mubr.msk.f32.vlgmr.msra.gmra.mrb[4].mxu1 %vm965_vm1, %v934_v16 }
 0x322   : > { %v924_v22 = vpop.f32.mrb[3].mxu1  ;;  %3059 = vmatpush3.bf16.msra.mxu1 %v3056_v13  ;;  %2743 = vmatprep.mubr.msk.f32.mxu1 %vm965_vm1, %v935_v17 }
 0x323   : > { %v3052_v24 = vpack.c.bf16 %v2735_v21, %v924_v22  ;;  %3061 = vmatprep.subr.bf16.mxu1 %v3060_v18 }
 0x325   : > { %3053 = vmatprep.subr.bf16.mxu0 %v3052_v24  ;;  %2744 = vmatmul.mubr.msk.f32.gmra.mrb[6].mxu1 %vm965_vm1, %v936_v23 }
 0x326   : > { %3055 = vmatpush3.bf16.msra.mxu0 %v3052_v24  ;;  %3063 = vmatpush3.bf16.msra.mxu1 %v3060_v18  ;;  %v3690_v24 = vld [vmem:[%s4005_s16 + $0x40] sm:$0xff] }
 0x327   : > { %2746 = vmatprep.mubr.msk.f32.mxu1 %vm965_vm1, %v937_v26  ;;  %3065 = vmatprep.subr.bf16.mxu1 %v3064_v25 }
 0x329   : > { %2747 = vmatmul.mubr.msk.f32.gmra.mrb[8].mxu1 %vm965_vm1, %v938_v29  ;;  %2769 = vmatmul.mubr.msk.f32.vlgmr.msra.gmra.mrb[2].mxu0 %vm965_vm1, %v934_v16  ;;  %v3671_v16 = vld [vmem:[%s4005_s16 + $0x38] sm:$0xff] }
 0x32a   : > { %3067 = vmatpush3.bf16.msra.mxu1 %v3064_v25  ;;  %2749 = vmatprep.mubr.msk.f32.mxu1 %vm965_vm1, %v939_v30 }
 0x32b   : > { %3069 = vmatprep.subr.bf16.mxu1 %v3068_v31  ;;  %2771 = vmatprep.mubr.msk.f32.mxu0 %vm965_vm1, %v935_v17  ;;  %v3676_v17 = vld [vmem:[%s4005_s16 + $0x30] sm:$0xff] }
 0x32d   : > { %2750 = vmatmul.mubr.msk.f32.gmra.mrb[10].mxu1 %vm965_vm1, %v940_v34  ;;  %2772 = vmatmul.mubr.msk.f32.gmra.mrb[4].mxu0 %vm965_vm1, %v936_v23  ;;  %v3683_v23 = vld [vmem:[%s4005_s16 + $0x48] sm:$0xff] }
 0x32e   : > { %3071 = vmatpush3.bf16.msra.mxu1 %v3068_v31  ;;  %2752 = vmatprep.mubr.msk.f32.mxu1 %vm965_vm1, %v941_v35  ;;  %v3704_v31 = vld [vmem:[%s4005_s16 + $0x50] sm:$0xff] }
 0x32f   : > { %3073 = vmatprep.subr.bf16.mxu1 %v3072_v36  ;;  %2774 = vmatprep.mubr.msk.f32.mxu0 %vm965_vm1, %v937_v26 }
 0x331   : > { %2753 = vmatmul.mubr.msk.f32.gmra.mrb[12].mxu1 %vm965_vm1, %v942_v39  ;;  %2775 = vmatmul.mubr.msk.f32.gmra.mrb[6].mxu0 %vm965_vm1, %v938_v29 }
 0x332   : > { %3075 = vmatpush3.bf16.msra.mxu1 %v3072_v36  ;;  %2755 = vmatprep.mubr.msk.f32.mxu1 %vm965_vm1, %v943_v40 }
 0x333   : > { %3077 = vmatprep.subr.bf16.mxu1 %v3076_v41  ;;  %2777 = vmatprep.mubr.msk.f32.mxu0 %vm965_vm1, %v939_v30  ;;  %v3699_v30 = vld [vmem:[%s4005_s16 + $0x58] sm:$0xff] }
 0x335   : > { %2756 = vmatmul.mubr.msk.f32.gmra.mrb[14].mxu1 %vm965_vm1, %v944_v44  ;;  %2778 = vmatmul.mubr.msk.f32.gmra.mrb[8].mxu0 %vm965_vm1, %v940_v34 }
 0x336   : > { %3079 = vmatpush3.bf16.msra.mxu1 %v3076_v41  ;;  %2758 = vmatprep.mubr.msk.f32.mxu1 %vm965_vm1, %v945_v45 }
 0x337   : > { %3081 = vmatprep.subr.bf16.mxu1 %v3080_v46  ;;  %2780 = vmatprep.mubr.msk.f32.mxu0 %vm965_vm1, %v941_v35 }
 0x339   : > { %2759 = vmatmul.mubr.msk.f32.gmra.mrb[16].mxu1 %vm965_vm1, %v946_v49  ;;  %2781 = vmatmul.mubr.msk.f32.gmra.mrb[10].mxu0 %vm965_vm1, %v942_v39 }
 0x33a   : > { %3083 = vmatpush3.bf16.msra.mxu1 %v3080_v46  ;;  %2761 = vmatprep.mubr.msk.f32.mxu1 %vm965_vm1, %v947_v50 }
 0x33b   : > { %3085 = vmatprep.subr.bf16.mxu1 %v3084_v51  ;;  %2783 = vmatprep.mubr.msk.f32.mxu0 %vm965_vm1, %v943_v40 }
 0x33d   : > { %2762 = vmatmul.mubr.msk.f32.gmra.mrb[18].mxu1 %vm965_vm1, %v948_v52  ;;  %2784 = vmatmul.mubr.msk.f32.gmra.mrb[12].mxu0 %vm965_vm1, %v944_v44  ;;  %v3727_v44 = vld [vmem:[%s4005_s16 + $0x78] sm:$0xff] }
 0x33e   : > { %3087 = vmatpush3.bf16.msra.mxu1 %v3084_v51  ;;  %2824 = vmatprep.mubr.f32.mxu1 %v1336_v53  ;;  %v2453_v51 = vld [vmem:[%s3998_s9] ss:$0 sm:$0xff] }
 0x33f   : > { %2786 = vmatprep.mubr.msk.f32.mxu0 %vm965_vm1, %v945_v45  ;;  %v3732_v45 = vld [vmem:[%s4005_s16 + $0x70] sm:$0xff] }
 0x341   : > { %2825 = vmatmul.mubr.f32.vlgmr.msra.gmra.mrb[20].mxu1 %v1337_v54  ;;  %2787 = vmatmul.mubr.msk.f32.gmra.mrb[14].mxu0 %vm965_vm1, %v946_v49 }
 0x342   : > { %2827 = vmatprep.mubr.f32.mxu1 %v1338_v55  ;;  %2789 = vmatprep.mubr.msk.f32.mxu0 %vm965_vm1, %v947_v50 }
 0x345   : > { %2828 = vmatmul.mubr.f32.gmra.mrb[22].mxu1 %v1339_v56  ;;  %2790 = vmatmul.mubr.msk.f32.gmra.mrb[16].mxu0 %vm965_vm1, %v948_v52 }
 0x346   : > { %2830 = vmatprep.mubr.f32.mxu1 %v1340_v57 }
 0x349   : > { %2831 = vmatmul.mubr.f32.gmra.mrb[24].mxu1 %v1341_v58 }
 0x3f4   : > { %v2742_v61 = vpop.f32.mrb[4].mxu1 }
 0x3f5   : > { %v1160_v62 = vmul.f32 %v2742_v61, %v3623_v59  ;;  %v1080_v63 = vpop.f32.mrb[5].mxu1 }
 0x3f6   : > { %v1159_v0 = vmul.f32 %v1080_v63, %v3628_v60 }
 0x3f8   : > { %v3096_v4 = vpack.c.bf16 %v1160_v62, %v1159_v0  ;;  %v2745_v5 = vpop.f32.mrb[6].mxu1 }
 0x3f9   : > { %v1162_v6 = vmul.f32 %v2745_v5, %v3635_v1  ;;  %v1090_v7 = vpop.f32.mrb[7].mxu1 }
 0x3fa   : > { %v1161_v8 = vmul.f32 %v1090_v7, %v3640_v2  ;;  %3098 = vmatprep.subr.msk.bf16.mxu0 %vm3644_vm2, %v3096_v4 }
 0x3fb   : > { %3101 = vmatpush3.bf16.xpose.msk.msra.mxu0 %vm3644_vm2, %v3096_v4 }
 0x3fc   : > { %v3102_v11 = vpack.c.bf16 %v1162_v6, %v1161_v8  ;;  %v2748_v12 = vpop.f32.mrb[8].mxu1 }
 0x3fd   : > { %v1164_v13 = vmul.f32 %v2748_v12, %v3655_v9  ;;  %v1100_v14 = vpop.f32.mrb[9].mxu1 }
 0x3fe   : > { %v1163_v15 = vmul.f32 %v1100_v14, %v3662_v10  ;;  %3104 = vmatprep.subr.msk.bf16.mxu0 %vm3644_vm2, %v3102_v11 }
 0x400   : > { %v3108_v18 = vpack.c.bf16 %v1164_v13, %v1163_v15  ;;  %v2751_v19 = vpop.f32.mrb[10].mxu1 }
 0x401   : > { %v1166_v20 = vmul.f32 %v2751_v19, %v3671_v16  ;;  %v1110_v21 = vpop.f32.mrb[11].mxu1 }
 0x402   : > { %v1165_v22 = vmul.f32 %v1110_v21, %v3676_v17 }
 0x403   : > { %3107 = vmatpush3.bf16.xpose.msk.msra.mxu0 %vm3644_vm2, %v3102_v11 }
 0x404   : > { %v3114_v25 = vpack.c.bf16 %v1166_v20, %v1165_v22  ;;  %v2754_v26 = vpop.f32.mrb[12].mxu1  ;;  %3110 = vmatprep.subr.msk.bf16.mxu0 %vm3644_vm2, %v3108_v18 }
 0x405   : > { %v1168_v27 = vmul.f32 %v2754_v26, %v3683_v23  ;;  %v1120_v28 = vpop.f32.mrb[13].mxu1 }
 0x406   : > { %v1167_v29 = vmul.f32 %v1120_v28, %v3690_v24 }
 0x408   : > { %v3120_v32 = vpack.c.bf16 %v1168_v27, %v1167_v29  ;;  %v2757_v33 = vpop.f32.mrb[14].mxu1 }
 0x409   : > { %v1170_v34 = vmul.f32 %v2757_v33, %v3699_v30  ;;  %v1130_v35 = vpop.f32.mrb[15].mxu1 }
 0x40a   : > { %v1169_v36 = vmul.f32 %v1130_v35, %v3704_v31 }
 0x40b   : > { %3113 = vmatpush3.bf16.xpose.msk.msra.mxu0 %vm3644_vm2, %v3108_v18 }
 0x40c   : > { %v3126_v39 = vpack.c.bf16 %v1170_v34, %v1169_v36  ;;  %v2760_v40 = vpop.f32.mrb[16].mxu1  ;;  %3116 = vmatprep.subr.msk.bf16.mxu0 %vm3644_vm2, %v3114_v25 }
 0x40d   : > { %v1172_v41 = vmul.f32 %v2760_v40, %v3711_v37  ;;  %v1140_v42 = vpop.f32.mrb[17].mxu1 }
 0x40e   : > { %v1171_v43 = vmul.f32 %v1140_v42, %v3718_v38 }
 0x410   : > { %v3132_v46 = vpack.c.bf16 %v1172_v41, %v1171_v43  ;;  %v2763_v47 = vpop.f32.mrb[18].mxu1 }
 0x411   : > { %v1174_v48 = vmul.f32 %v2763_v47, %v3727_v44  ;;  %v1150_v49 = vpop.f32.mrb[19].mxu1 }
 0x412   : > { %v1173_v50 = vmul.f32 %v1150_v49, %v3732_v45 }
 0x413   : > { %3119 = vmatpush3.bf16.xpose.msk.msra.mxu0 %vm3644_vm2, %v3114_v25 }
 0x414   : > { %v3138_v52 = vpack.c.bf16 %v1174_v48, %v1173_v50  ;;  %v2826_v53 = vpop.f32.mrb[20].mxu1  ;;  %3122 = vmatprep.subr.msk.bf16.mxu0 %vm3644_vm2, %v3120_v32 }
 0x415   : > { %v1437_v54 = vadd.f32 %v2826_v53, %v2453_v51  ;;  %v1431_v55 = vpop.f32.mrb[21].mxu1  ;;  %v1564_v53 = vld [vmem:[%s4001_s12] sm:$0xff] }
 0x416   : > { %v1432_v56 = vadd.f32 %v2453_v51, %v1431_v55 }
 0x417   : > { %v1463_v57 = vsel %vm723_vm0, %v1437_v54, 0.0 }
 0x418   : > { %1464 = vadd.xlane.f32.xlu1 %v1463_v57  ;;  %v2829_v58 = vpop.f32.mrb[22].mxu1  ;;  %v1460_v61 = vsel %vm723_vm0, %v1432_v56, 0.0  ;;  %v1567_v57 = vld [vmem:[%s4001_s12 + $0x18] sm:$0xff] }
 0x419   : > { %v1447_v62 = vadd.f32 %v2829_v58, %v2453_v51  ;;  %v1441_v63 = vpop.f32.mrb[23].mxu1  ;;  %1461 = vadd.xlane.f32.xlu0 %v1460_v61 }
 0x41a   : > { %v1442_v0 = vadd.f32 %v2453_v51, %v1441_v63 }
 0x41b   : > { %3125 = vmatpush3.bf16.xpose.msk.msra.mxu0 %vm3644_vm2, %v3120_v32  ;;  %v1469_v4 = vsel %vm723_vm0, %v1447_v62, 0.0 }
 0x41c   : > { %3128 = vmatprep.subr.msk.bf16.mxu0 %vm3644_vm2, %v3126_v39  ;;  %1470 = vadd.xlane.f32.xlu1 %v1469_v4  ;;  %v2832_v5 = vpop.f32.mrb[24].mxu1  ;;  %v1466_v6 = vsel %vm723_vm0, %v1442_v0, 0.0 }
 0x41d   : > { %v1457_v7 = vadd.f32 %v2832_v5, %v2453_v51  ;;  %v1451_v8 = vpop.f32.mrb[25].mxu1  ;;  %1467 = vadd.xlane.f32.xlu0 %v1466_v6 }
 0x41e   : > { %v1452_v11 = vadd.f32 %v2453_v51, %v1451_v8 }
 0x41f   : > { %v1475_v12 = vsel %vm723_vm0, %v1457_v7, 0.0 }
 0x420   : > { %1476 = vadd.xlane.f32.xlu1 %v1475_v12  ;;  %v1472_v13 = vsel %vm723_vm0, %v1452_v11, 0.0 }
 0x421   : > { %1473 = vadd.xlane.f32.xlu0 %v1472_v13 }
 0x423   : > { %3131 = vmatpush3.bf16.xpose.msk.msra.mxu0 %vm3644_vm2, %v3126_v39 }
 0x424   : > { %3134 = vmatprep.subr.msk.bf16.mxu0 %vm3644_vm2, %v3132_v46 }
 0x42b   : > { %3137 = vmatpush3.bf16.xpose.msk.msra.mxu0 %vm3644_vm2, %v3132_v46 }
 0x42c   : > { %3140 = vmatprep.subr.msk.bf16.mxu0 %vm3644_vm2, %v3138_v52 }
 0x433   : > { %3143 = vmatpush3.bf16.xpose.msk.msra.mxu0 %vm3644_vm2, %v3138_v52 }
 0x4a5   : > { %v1465_v14 = vpop.xlane.xlu1 %1464 }
 0x4a6   : > { %v1479_v15 = vmul.f32 0.03125, %v1465_v14  ;;  %v1462_v18 = vpop.xlane.xlu0 %1461 }
 0x4a7   : > { %v1478_v19 = vmul.f32 0.03125, %v1462_v18 }
 0x4a8   : > { %v3763_v20 = vsub.f32 %v1437_v54, %v1479_v15  ;;  %v1565_v54 = vld [vmem:[%s4001_s12 + $0x8] sm:$0xff] }
 0x4a9   : > { %v3765_v21 = vsub.f32 %v1432_v56, %v1478_v19  ;;  %v1471_v22 = vpop.xlane.xlu1 %1470  ;;  %v3088_v55 = vpack.c.bf16 %v1565_v54, %v1564_v53  ;;  %v1566_v56 = vld [vmem:[%s4001_s12 + $0x10] sm:$0xff] }
 0x4aa   : > { %v1481_v25 = vmul.f32 0.03125, %v1471_v22  ;;  %v1468_v26 = vpop.xlane.xlu0 %1467  ;;  %v1491_v27 = vmul.f32 %v3763_v20, %v3763_v20  ;;  %v3092_v58 = vpack.c.bf16 %v1567_v57, %v1566_v56  ;;  %v1880_v57 = vld [vmem:[%s4006_s17 + $0x10] sm:$0xff] }
 0x4ab   : > { %v1480_v28 = vmul.f32 0.03125, %v1468_v26  ;;  %v1490_v29 = vmul.f32 %v3765_v21, %v3765_v21  ;;  %3089 = vmatprep.subr.bf16.mxu1 %v3088_v55 }
 0x4ac   : > { %v3771_v3 = vsub.f32 %v1447_v62, %v1481_v25  ;;  %v1499_v32 = vsel %vm723_vm0, %v1491_v27, 0.0  ;;  %3091 = vmatpush3.bf16.msra.mxu1 %v3088_v55  ;;  %v2454_v27 = vld [vmem:[%s3999_s10] ss:$0 sm:$0xff] }
 0x4ad   : > { %v3774_v33 = vsub.f32 %v1442_v0, %v1480_v28  ;;  %1500 = vadd.xlane.f32.xlu1 %v1499_v32  ;;  %v1477_v34 = vpop.xlane.xlu1 %1476  ;;  %v1496_v35 = vsel %vm723_vm0, %v1490_v29, 0.0  ;;  %3093 = vmatprep.subr.bf16.mxu1 %v3092_v58 }
 0x4ae   : > { %v1483_v36 = vmul.f32 0.03125, %v1477_v34  ;;  %1497 = vadd.xlane.f32.xlu0 %v1496_v35  ;;  %v1474_v39 = vpop.xlane.xlu0 %1473  ;;  %v1493_v40 = vmul.f32 %v3771_v3, %v3771_v3  ;;  %v2455_v34 = vld [vmem:[%s4000_s11] ss:$0 sm:$0xff] }
 0x4af   : > { %v1482_v41 = vmul.f32 0.03125, %v1474_v39  ;;  %v1492_v42 = vmul.f32 %v3774_v33, %v3774_v33 }
 0x4b0   : > { %v3781_v43 = vsub.f32 %v1457_v7, %v1483_v36  ;;  %v1505_v46 = vsel %vm723_vm0, %v1493_v40, 0.0  ;;  %3095 = vmatpush3.bf16.msra.mxu1 %v3092_v58  ;;  %v2770_v58 = vpop.f32.mrb[2].mxu0 }
 0x4b1   : > { %v3784_v47 = vsub.f32 %v1452_v11, %v1482_v41  ;;  %1506 = vadd.xlane.f32.xlu1 %v1505_v46  ;;  %v1502_v48 = vsel %vm723_vm0, %v1492_v42, 0.0 }
 0x4b2   : > { %1503 = vadd.xlane.f32.xlu0 %v1502_v48  ;;  %v1495_v49 = vmul.f32 %v3781_v43, %v3781_v43 }
 0x4b3   : > { %v1494_v50 = vmul.f32 %v3784_v47, %v3784_v47 }
 0x4b4   : > { %v1511_v51 = vsel %vm723_vm0, %v1495_v49, 0.0 }
 0x4b5   : > { %1512 = vadd.xlane.f32.xlu1 %v1511_v51  ;;  %v1508_v52 = vsel %vm723_vm0, %v1494_v50, 0.0 }
 0x4b6   : > { %1509 = vadd.xlane.f32.xlu0 %v1508_v52 }
 0x53a   : > { %v1501_v61 = vpop.xlane.xlu1 %1500 }
 0x53b   : > { %v1515_v62 = vmul.f32 0.03125, %v1501_v61  ;;  %v1498_v63 = vpop.xlane.xlu0 %1497 }
 0x53c   : > { %v1514_v0 = vmul.f32 0.03125, %v1498_v63  ;;  %v1321_v63 = vmul.f32 %v2770_v58, %v3623_v59 }
 0x53d   : > { %v1521_v4 = vadd.f32 1e-05, %v1515_v62  ;;  %v1881_v62 = vld [vmem:[%s4006_s17 + $0x18] sm:$0xff] }
 0x53e   : > { %v1520_v5 = vadd.f32 1e-05, %v1514_v0  ;;  %v1507_v6 = vpop.xlane.xlu1 %1506  ;;  %v1241_v0 = vpop.f32.mrb[3].mxu0 }
 0x53f   : > { %3237 = vrsqrt.f32 %v1521_v4  ;;  %v1517_v7 = vmul.f32 0.03125, %v1507_v6  ;;  %v1504_v8 = vpop.xlane.xlu0 %1503  ;;  %v3148_v4 = vpack.c.bf16 %v1881_v62, %v1880_v57  ;;  %v1883_v6 = vld [vmem:[%s4006_s17 + $0x28] sm:$0xff] }
 0x540   : > { %3239 = vrsqrt.f32 %v1520_v5  ;;  %v1516_v11 = vmul.f32 0.03125, %v1504_v8  ;;  %v1882_v5 = vld [vmem:[%s4006_s17 + $0x20] sm:$0xff]  ;;  %v2773_v8 = vpop.f32.mrb[4].mxu0 }
 0x541   : > { %v1523_v12 = vadd.f32 1e-05, %v1517_v7  ;;  %v1320_v7 = vmul.f32 %v1241_v0, %v3628_v60  ;;  %v1884_v60 = vld [vmem:[%s4006_s17 + $0x30] sm:$0xff] }
 0x542   : > { %v1522_v13 = vadd.f32 1e-05, %v1516_v11  ;;  %v1513_v14 = vpop.xlane.xlu1 %1512  ;;  %v1323_v11 = vmul.f32 %v2773_v8, %v3635_v1  ;;  %v1885_v1 = vld [vmem:[%s4006_s17 + $0x38] sm:$0xff] }
 0x543   : > { %3241 = vrsqrt.f32 %v1523_v12  ;;  %v1519_v15 = vmul.f32 0.03125, %v1513_v14  ;;  %v1510_v18 = vpop.xlane.xlu0 %1509  ;;  %v1251_v12 = vpop.f32.mrb[5].mxu0 }
 0x544   : > { %3243 = vrsqrt.f32 %v1522_v13  ;;  %v1518_v19 = vmul.f32 0.03125, %v1510_v18  ;;  %v3844_v13 = vpack.c.bf16 %v1321_v63, %v1320_v7  ;;  %v1322_v59 = vmul.f32 %v1251_v12, %v3640_v2  ;;  %v2776_v14 = vpop.f32.mrb[6].mxu0 }
 0x545   : > { %v1525_v22 = vadd.f32 1e-05, %v1519_v15  ;;  %v3152_v15 = vpack.c.bf16 %v1883_v6, %v1882_v5  ;;  %v1325_v18 = vmul.f32 %v2776_v14, %v3655_v9 }
 0x546   : > { %v1524_v25 = vadd.f32 1e-05, %v1518_v19  ;;  %v1261_v19 = vpop.f32.mrb[7].mxu0 }
 0x547   : > { %3245 = vrsqrt.f32 %v1525_v22  ;;  %v3854_v22 = vpack.c.bf16 %v1323_v11, %v1322_v59 }
 0x548   : > { %3247 = vrsqrt.f32 %v1524_v25  ;;  %v1324_v25 = vmul.f32 %v1261_v19, %v3662_v10  ;;  %v1887_v10 = vld [vmem:[%s4006_s17 + $0x48] sm:$0xff] }
 0x549   : > { %v3238_v26 = vpop.eup %3237 }
 0x54a   : > { %v3240_v28 = vpop.eup %3239  ;;  %v1533_v29 = vmul.f32 %v3238_v26, %v3763_v20  ;;  %v2779_v26 = vpop.f32.mrb[8].mxu0 }
 0x54b   : > { %v1532_v32 = vmul.f32 %v3240_v28, %v3765_v21  ;;  %v1327_v2 = vmul.f32 %v2779_v26, %v3671_v16  ;;  %v3858_v28 = vpack.c.bf16 %v1325_v18, %v1324_v25 }
 0x54c   : > { %v1546_v35 = vmul.f32 %v2454_v27, %v1533_v29 }
 0x54d   : > { %v3242_v36 = vpop.eup %3241  ;;  %v1545_v39 = vmul.f32 %v2454_v27, %v1532_v32  ;;  %v3156_v32 = vpack.c.bf16 %v1885_v1, %v1884_v60 }
 0x54e   : > { %v3244_v40 = vpop.eup %3243  ;;  %v1535_v41 = vmul.f32 %v3242_v36, %v3771_v3  ;;  %v1559_v48 = vadd.f32 %v2455_v34, %v1546_v35  ;;  %v1886_v36 = vld [vmem:[%s4006_s17 + $0x40] sm:$0xff] }
 0x54f   : > { %v1558_v42 = vadd.f32 %v2455_v34, %v1545_v39  ;;  %v1534_v46 = vmul.f32 %v3244_v40, %v3774_v33 }
 0x550   : > { %v1548_v49 = vmul.f32 %v2454_v27, %v1535_v41 }
 0x551   : > { %v3246_v50 = vpop.eup %3245  ;;  %2841 = vmatprep.mubr.msk.f32.mxu1 %vm723_vm0, %v1558_v42  ;;  %v1547_v20 = vmul.f32 %v2454_v27, %v1534_v46 }
 0x552   : > { %v3248_v21 = vpop.eup %3247  ;;  %2842 = vmatmul.mubr.msk.f32.vlgmr.msra.gmra.mrb[26].mxu1 %vm723_vm0, %v1559_v48  ;;  %v1537_v51 = vmul.f32 %v3246_v50, %v3781_v43  ;;  %v1561_v54 = vadd.f32 %v2455_v34, %v1548_v49  ;;  %v1878_v43 = vld [vmem:[%s4006_s17] sm:$0xff]  ;;  %v3160_v48 = vpack.c.bf16 %v1887_v10, %v1886_v36 }
 0x553   : > { %v1560_v52 = vadd.f32 %v2455_v34, %v1547_v20  ;;  %v1536_v53 = vmul.f32 %v3248_v21, %v3784_v47  ;;  %v1879_v47 = vld [vmem:[%s4006_s17 + $0x8] sm:$0xff]  ;;  %v1888_v20 = vld [vmem:[%s4006_s17 + $0x50] sm:$0xff] }
 0x554   : > { %v1550_v55 = vmul.f32 %v2454_v27, %v1537_v51  ;;  %v3144_v61 = vpack.c.bf16 %v1879_v47, %v1878_v43 }
 0x555   : > { %2844 = vmatprep.mubr.msk.f32.mxu1 %vm723_vm0, %v1560_v52  ;;  %v1549_v3 = vmul.f32 %v2454_v27, %v1536_v53  ;;  %v1271_v27 = vpop.f32.mrb[9].mxu0 }
 0x556   : > { %2845 = vmatmul.mubr.msk.f32.gmra.mrb[28].mxu1 %vm723_vm0, %v1561_v54  ;;  %v1563_v56 = vadd.f32 %v2455_v34, %v1550_v55  ;;  %3145 = vmatprep.subr.bf16.mxu1 %v3144_v61  ;;  %v1326_v9 = vmul.f32 %v1271_v27, %v3676_v17  ;;  %v2782_v29 = vpop.f32.mrb[10].mxu0  ;;  %v1890_v55 = vld [vmem:[%s4006_s17 + $0x60] sm:$0xff] }
 0x557   : > { %v1562_v33 = vadd.f32 %v2455_v34, %v1549_v3  ;;  %3147 = vmatpush3.bf16.msra.mxu1 %v3144_v61  ;;  %v1329_v34 = vmul.f32 %v2782_v29, %v3683_v23  ;;  %v1281_v35 = vpop.f32.mrb[11].mxu0  ;;  %v1891_v3 = vld [vmem:[%s4006_s17 + $0x68] sm:$0xff] }
 0x558   : > { %3149 = vmatprep.subr.bf16.mxu1 %v3148_v4  ;;  %v3868_v16 = vpack.c.bf16 %v1327_v2, %v1326_v9  ;;  %v1328_v39 = vmul.f32 %v1281_v35, %v3690_v24  ;;  %v2785_v40 = vpop.f32.mrb[12].mxu0  ;;  %v1889_v24 = vld [vmem:[%s4006_s17 + $0x58] sm:$0xff] }
 0x559   : > { %2847 = vmatprep.mubr.msk.f32.mxu1 %vm723_vm0, %v1562_v33  ;;  %v1331_v17 = vmul.f32 %v2785_v40, %v3699_v30  ;;  %v1291_v41 = vpop.f32.mrb[13].mxu0  ;;  %v3164_v54 = vpack.c.bf16 %v1889_v24, %v1888_v20  ;;  %v1892_v33 = vld [vmem:[%s4006_s17 + $0x70] sm:$0xff] }
 0x55a   : > { %2848 = vmatmul.mubr.msk.f32.gmra.mrb[30].mxu1 %vm723_vm0, %v1563_v56  ;;  %v3872_v42 = vpack.c.bf16 %v1329_v34, %v1328_v39  ;;  %v1330_v23 = vmul.f32 %v1291_v41, %v3704_v31  ;;  %v2788_v46 = vpop.f32.mrb[14].mxu0 }
 0x55b   : > { %3151 = vmatpush3.bf16.msra.mxu1 %v3148_v4  ;;  %v1333_v49 = vmul.f32 %v2788_v46, %v3711_v37  ;;  %v1301_v50 = vpop.f32.mrb[15].mxu0 }
 0x55c   : > { %3153 = vmatprep.subr.bf16.mxu1 %v3152_v15  ;;  %v3882_v30 = vpack.c.bf16 %v1331_v17, %v1330_v23  ;;  %v1332_v21 = vmul.f32 %v1301_v50, %v3718_v38  ;;  %v2791_v51 = vpop.f32.mrb[16].mxu0 }
 0x55d   : > { %v1335_v31 = vmul.f32 %v2791_v51, %v3727_v44  ;;  %v1311_v52 = vpop.f32.mrb[17].mxu0  ;;  %v3168_v44 = vpack.c.bf16 %v1891_v3, %v1890_v55 }
 0x55e   : > { %v3886_v53 = vpack.c.bf16 %v1333_v49, %v1332_v21  ;;  %v1334_v37 = vmul.f32 %v1311_v52, %v3732_v45  ;;  %v1893_v45 = vld [vmem:[%s4006_s17 + $0x78] sm:$0xff] }
 0x55f   : > { %3155 = vmatpush3.bf16.msra.mxu1 %v3152_v15  ;;  %v3172_v56 = vpack.c.bf16 %v1893_v45, %v1892_v33 }
 0x560   : > { %3157 = vmatprep.subr.bf16.mxu1 %v3156_v32  ;;  %v3895_v38 = vpack.c.bf16 %v1335_v31, %v1334_v37 }
 0x563   : > { %3159 = vmatpush3.bf16.msra.mxu1 %v3156_v32 }
 0x564   : > { %3161 = vmatprep.subr.bf16.mxu1 %v3160_v48 }
 0x567   : > { %3163 = vmatpush3.bf16.msra.mxu1 %v3160_v48 }
 0x568   : > { %3165 = vmatprep.subr.bf16.mxu1 %v3164_v54 }
 0x56b   : > { %3167 = vmatpush3.bf16.msra.mxu1 %v3164_v54 }
 0x56c   : > { %3169 = vmatprep.subr.bf16.mxu1 %v3168_v44 }
 0x56f   : > { %3171 = vmatpush3.bf16.msra.mxu1 %v3168_v44 }
 0x570   : > { %3173 = vmatprep.subr.bf16.mxu1 %v3172_v56 }
 0x573   : > { %3175 = vmatpush3.bf16.msra.mxu1 %v3172_v56 }
 0x574   : > { %3177 = vmatprep.subr.bf16.mxu1 %v3844_v13 }
 0x625   : > { %v2843_v43 = vpop.f32.mrb[26].mxu1 }
 0x626   : > { %v1652_v47 = vpop.f32.mrb[27].mxu1 }
 0x627   : > { %2882 = vmatprep.mubr.msk.f32.mxu0 %vm723_vm0, %v1652_v47 }
 0x628   : > { %2883 = vmatmul.mubr.msk.f32.vlgmr.msra.gmra.mrb[18].mxu0 %vm723_vm0, %v2843_v43 }
 0x629   : > { %v2846_v57 = vpop.f32.mrb[28].mxu1 }
 0x62a   : > { %v1662_v58 = vpop.f32.mrb[29].mxu1 }
 0x62b   : > { %2885 = vmatprep.mubr.msk.f32.mxu0 %vm723_vm0, %v1662_v58 }
 0x62c   : > { %2886 = vmatmul.mubr.msk.f32.gmra.mrb[20].mxu0 %vm723_vm0, %v2846_v57 }
 0x62d   : > { %v2849_v61 = vpop.f32.mrb[30].mxu1 }
 0x62e   : > { %v1672_v62 = vpop.f32.mrb[31].mxu1 }
 0x62f   : > { %2888 = vmatprep.mubr.msk.f32.mxu0 %vm723_vm0, %v1672_v62  ;;  %v2484_v62 = vld [vmem:[%s4003_s14] ss:$0 sm:$0xff] }
 0x630   : > { %2889 = vmatmul.mubr.msk.f32.gmra.mrb[22].mxu0 %vm723_vm0, %v2849_v61  ;;  %v2192_v61 = vld [vmem:[%s4007_s18] sm:$0xff] }
 0x6fb   : > { %v2884_v63 = vpop.f32.mrb[18].mxu0 }
 0x6fc   : > { %v1843_v0 = vmul.f32 0.5, %v2884_v63  ;;  %v1813_v4 = vpop.f32.mrb[19].mxu0 }
 0x6fd   : > { %v1842_v5 = vmul.f32 0.5, %v1813_v4 }
 0x6fe   : > { %1850 = vmax.xlane.f32.xlu1 %v1843_v0 }
 0x6ff   : > { %1848 = vmax.xlane.f32.xlu0 %v1842_v5  ;;  %v2887_v6 = vpop.f32.mrb[20].mxu0 }
 0x700   : > { %v1845_v7 = vmul.f32 0.5, %v2887_v6  ;;  %v1823_v8 = vpop.f32.mrb[21].mxu0 }
 0x701   : > { %v1844_v11 = vmul.f32 0.5, %v1823_v8  ;;  %v2194_v8 = vld [vmem:[%s4007_s18 + $0x10] sm:$0xff] }
 0x702   : > { %1854 = vmax.xlane.f32.xlu1 %v1845_v7 }
 0x703   : > { %1852 = vmax.xlane.f32.xlu0 %v1844_v11  ;;  %v2890_v12 = vpop.f32.mrb[22].mxu0 }
 0x704   : > { %v1847_v59 = vmul.f32 0.5, %v2890_v12  ;;  %v1833_v14 = vpop.f32.mrb[23].mxu0  ;;  %v2196_v12 = vld [vmem:[%s4007_s18 + $0x20] sm:$0xff] }
 0x705   : > { %v1846_v15 = vmul.f32 0.5, %v1833_v14  ;;  %v2198_v14 = vld [vmem:[%s4007_s18 + $0x30] sm:$0xff] }
 0x706   : > { %1858 = vmax.xlane.f32.xlu1 %v1847_v59 }
 0x707   : > { %1856 = vmax.xlane.f32.xlu0 %v1846_v15 }
 0x78b   : > { %v1851_v18 = vpop.xlane.xlu1 %1850 }
 0x78c   : > { %v1861_v19 = vsub.f32 %v1843_v0, %v1851_v18  ;;  %v1849_v60 = vpop.xlane.xlu0 %1848 }
 0x78d   : > { %v1860_v1 = vsub.f32 %v1842_v5, %v1849_v60 }
 0x78e   : > { %v1868_v25 = vmul.f32 1.442695, %v1861_v19 }
 0x78f   : > { %v1866_v26 = vmul.f32 1.442695, %v1860_v1  ;;  %v1855_v2 = vpop.xlane.xlu1 %1854 }
 0x790   : > { %v1863_v27 = vsub.f32 %v1845_v7, %v1855_v2  ;;  %v1853_v9 = vpop.xlane.xlu0 %1852  ;;  %v2193_v7 = vld [vmem:[%s4007_s18 + $0x8] sm:$0xff] }
 0x791   : > { %3249 = vpow2.f32 %v1866_v26  ;;  %v1862_v29 = vsub.f32 %v1844_v11, %v1853_v9  ;;  %v2195_v11 = vld [vmem:[%s4007_s18 + $0x18] sm:$0xff] }
 0x792   : > { %3251 = vpow2.f32 %v1868_v25  ;;  %v1872_v32 = vmul.f32 1.442695, %v1863_v27 }
 0x793   : > { %v1870_v34 = vmul.f32 1.442695, %v1862_v29  ;;  %v1859_v35 = vpop.xlane.xlu1 %1858 }
 0x794   : > { %v1865_v36 = vsub.f32 %v1847_v59, %v1859_v35  ;;  %v1857_v10 = vpop.xlane.xlu0 %1856  ;;  %v2197_v59 = vld [vmem:[%s4007_s18 + $0x28] sm:$0xff] }
 0x795   : > { %3253 = vpow2.f32 %v1870_v34  ;;  %v1864_v39 = vsub.f32 %v1846_v15, %v1857_v10  ;;  %v2199_v15 = vld [vmem:[%s4007_s18 + $0x38] sm:$0xff] }
 0x796   : > { %3255 = vpow2.f32 %v1872_v32  ;;  %v1876_v40 = vmul.f32 1.442695, %v1865_v36 }
 0x797   : > { %v1874_v17 = vmul.f32 1.442695, %v1864_v39 }
 0x799   : > { %3257 = vpow2.f32 %v1874_v17 }
 0x79a   : > { %3259 = vpow2.f32 %v1876_v40 }
 0x79b   : > { %v3250_v41 = vpop.eup %3249 }
 0x79c   : > { %v3252_v23 = vpop.eup %3251  ;;  %2923 = vmatprep.mubr.f32.mxu1 %v3250_v41 }
 0x79d   : > { %2924 = vmatmul.mubr.f32.vlgmr.msra.gmra.mrb[32].mxu1 %v3252_v23 }
 0x79e   : > { %3179 = vmatpush3.bf16.msra.mxu1 %v3844_v13  ;;  %v2100_v13 = vld [vmem:[%s4002_s13] sm:$0xff] }
 0x79f   : > { %v3254_v46 = vpop.eup %3253  ;;  %3181 = vmatprep.subr.bf16.mxu1 %v3854_v22 }
 0x7a0   : > { %v3256_v48 = vpop.eup %3255  ;;  %2926 = vmatprep.mubr.f32.mxu1 %v3254_v46 }
 0x7a1   : > { %2927 = vmatmul.mubr.f32.gmra.mrb[34].mxu1 %v3256_v48 }
 0x7a2   : > { %3183 = vmatpush3.bf16.msra.mxu1 %v3854_v22  ;;  %v2101_v22 = vld [vmem:[%s4002_s13 + $0x8] sm:$0xff] }
 0x7a3   : > { %v3258_v49 = vpop.eup %3257  ;;  %3185 = vmatprep.subr.bf16.mxu1 %v3858_v28 }
 0x7a4   : > { %v3260_v50 = vpop.eup %3259  ;;  %2929 = vmatprep.mubr.f32.mxu1 %v3258_v49 }
 0x7a5   : > { %2930 = vmatmul.mubr.f32.gmra.mrb[36].mxu1 %v3260_v50 }
 0x7a6   : > { %3187 = vmatpush3.bf16.msra.mxu1 %v3858_v28  ;;  %v2102_v28 = vld [vmem:[%s4002_s13 + $0x10] sm:$0xff] }
 0x7a7   : > { %3189 = vmatprep.subr.bf16.mxu1 %v3868_v16 }
 0x7aa   : > { %3191 = vmatpush3.bf16.msra.mxu1 %v3868_v16  ;;  %v3208_v16 = vpack.c.bf16 %v2101_v22, %v2100_v13 }
 0x7ab   : > { %3193 = vmatprep.subr.bf16.mxu1 %v3872_v42 }
 0x7ac   : > { %3209 = vmatprep.subr.bf16.mxu0 %v3208_v16 }
 0x7ad   : > { %3211 = vmatpush3.bf16.msra.mxu0 %v3208_v16 }
 0x7ae   : > { %3195 = vmatpush3.bf16.msra.mxu1 %v3872_v42  ;;  %v2103_v42 = vld [vmem:[%s4002_s13 + $0x18] sm:$0xff] }
 0x7af   : > { %3197 = vmatprep.subr.bf16.mxu1 %v3882_v30  ;;  %v3212_v20 = vpack.c.bf16 %v2103_v42, %v2102_v28 }
 0x7b1   : > { %3213 = vmatprep.subr.bf16.mxu0 %v3212_v20 }
 0x7b2   : > { %3199 = vmatpush3.bf16.msra.mxu1 %v3882_v30  ;;  %3215 = vmatpush3.bf16.msra.mxu0 %v3212_v20 }
 0x7b3   : > { %3201 = vmatprep.subr.bf16.mxu1 %v3886_v53 }
 0x7b6   : > { %3203 = vmatpush3.bf16.msra.mxu1 %v3886_v53 }
 0x7b7   : > { %3205 = vmatprep.subr.bf16.mxu1 %v3895_v38 }
 0x7ba   : > { %3207 = vmatpush3.bf16.msra.mxu1 %v3895_v38 }
 0x870   : > { %v2925_v24 = vpop.f32.mrb[32].mxu1 }
 0x871   : > { %3261 = vrcp.f32 %v2925_v24  ;;  %v1960_v30 = vpop.f32.mrb[33].mxu1 }
 0x872   : > { %3263 = vrcp.f32 %v1960_v30 }
 0x874   : > { %v2928_v21 = vpop.f32.mrb[34].mxu1 }
 0x875   : > { %v1970_v51 = vpop.f32.mrb[35].mxu1 }
 0x876   : > { %3265 = vrcp.f32 %v1970_v51 }
 0x877   : > { %3267 = vrcp.f32 %v2928_v21 }
 0x878   : > { %v2931_v31 = vpop.f32.mrb[36].mxu1 }
 0x879   : > { %v1980_v52 = vpop.f32.mrb[37].mxu1 }
 0x87a   : > { %3269 = vrcp.f32 %v1980_v52 }
 0x87b   : > { %v3262_v53 = vpop.eup %3261  ;;  %3271 = vrcp.f32 %v2931_v31 }
 0x87c   : > { %v3264_v37 = vpop.eup %3263  ;;  %v1996_v55 = vmul.f32 %v3262_v53, %v3252_v23 }
 0x87d   : > { %v1995_v54 = vmul.f32 %v3264_v37, %v3250_v41 }
 0x87f   : > { %2964 = vmatprep.mubr.f32.mxu1 %v1995_v54 }
 0x880   : > { %v3266_v3 = vpop.eup %3265  ;;  %2965 = vmatmul.mubr.f32.vlgmr.msra.gmra.mrb[38].mxu1 %v1996_v55 }
 0x881   : > { %v1997_v38 = vmul.f32 %v3266_v3, %v3254_v46  ;;  %v3268_v44 = vpop.eup %3267 }
 0x882   : > { %v1998_v45 = vmul.f32 %v3268_v44, %v3256_v48 }
 0x883   : > { %2967 = vmatprep.mubr.f32.mxu1 %v1997_v38 }
 0x884   : > { %v3270_v33 = vpop.eup %3269 }
 0x885   : > { %v1999_v56 = vmul.f32 %v3270_v33, %v3258_v49  ;;  %v3272_v43 = vpop.eup %3271 }
 0x886   : > { %v2000_v47 = vmul.f32 %v3272_v43, %v3260_v50 }
 0x888   : > { %2968 = vmatmul.mubr.f32.gmra.mrb[38].mxu1 %v1998_v45 }
 0x889   : > { %2970 = vmatprep.mubr.f32.mxu1 %v1999_v56 }
 0x890   : > { %2971 = vmatmul.mubr.f32.gmra.mrb[38].mxu1 %v2000_v47 }
 0x963   : > { %v2972_v57 = vpop.f32.mrb[38].mxu1 }
 0x964   : > { %v2087_v58 = vpop.f32.mrb[39].mxu1 }
 0x965   : > { %2981 = vmatprep.mubr.msk.f32.mxu0 %vm723_vm0, %v2087_v58 }
 0x966   : > { %2982 = vmatmul.mubr.msk.f32.vlgmr.msra.gmra.mrb[24].mxu0 %vm723_vm0, %v2972_v57 }
 0x967   : > { %2988 = vmatprep.mubr.msk.f32.mxu0 %vm965_vm1, %v2192_v61 }
 0xa39   : > { %v2983_v63 = vpop.f32.mrb[24].mxu0 }
 0xa3a   : > { %v2189_v0 = vadd.f32 %v2983_v63, %v2484_v62  ;;  %v2183_v4 = vpop.f32.mrb[25].mxu0 }
 0xa3b   : > { %v2184_v5 = vadd.f32 %v2484_v62, %v2183_v4 }
 0xa3d   : > { %v3216_v6 = vpack.c.bf16 %v2189_v0, %v2184_v5 }
 0xa3f   : > { %3217 = vmatprep.subr.bf16.mxu0 %v3216_v6 }
 0xa40   : > { %3219 = vmatpush3.bf16.msra.mxu0 %v3216_v6 }
 0xa43   : > { %2989 = vmatmul.mubr.msk.f32.vlgmr.msra.gmra.mrb[26].mxu0 %vm965_vm1, %v2193_v7 }
 0xa44   : > { %2991 = vmatprep.mubr.msk.f32.mxu0 %vm965_vm1, %v2194_v8 }
 0xa47   : > { %2992 = vmatmul.mubr.msk.f32.gmra.mrb[28].mxu0 %vm965_vm1, %v2195_v11 }
 0xa48   : > { %2994 = vmatprep.mubr.msk.f32.mxu0 %vm965_vm1, %v2196_v12 }
 0xa4b   : > { %2995 = vmatmul.mubr.msk.f32.gmra.mrb[30].mxu0 %vm965_vm1, %v2197_v59 }
 0xa4c   : > { %2997 = vmatprep.mubr.msk.f32.mxu0 %vm965_vm1, %v2198_v14 }
 0xa4f   : > { %2998 = vmatmul.mubr.msk.f32.gmra.mrb[32].mxu0 %vm965_vm1, %v2199_v15 }
 0xb16   : > { %v2990_v18 = vpop.f32.mrb[26].mxu0 }
 0xb17   : > { %2330 = vst.msk [vmem:[%s622_s28 + $0x8] sm:$0xff] %vm723_vm0, %v2990_v18  ;;  %v2290_v19 = vpop.f32.mrb[27].mxu0 }
 0xb18   : > { %2329 = vst.msk [vmem:[%s622_s28] sm:$0xff] %vm723_vm0, %v2290_v19 }
 0xb1a   : > { %v2993_v60 = vpop.f32.mrb[28].mxu0 }
 0xb1b   : > { %2332 = vst.msk [vmem:[%s622_s28 + $0x18] sm:$0xff] %vm723_vm0, %v2993_v60  ;;  %v2300_v1 = vpop.f32.mrb[29].mxu0 }
 0xb1c   : > { %2331 = vst.msk [vmem:[%s622_s28 + $0x10] sm:$0xff] %vm723_vm0, %v2300_v1 }
 0xb1e   : > { %v2996_v25 = vpop.f32.mrb[30].mxu0 }
 0xb1f   : > { %2334 = vst.msk [vmem:[%s622_s28 + $0x28] sm:$0xff] %vm723_vm0, %v2996_v25  ;;  %v2310_v26 = vpop.f32.mrb[31].mxu0 }
 0xb20   : > { %2333 = vst.msk [vmem:[%s622_s28 + $0x20] sm:$0xff] %vm723_vm0, %v2310_v26 }
 0xb22   : > { %v2999_v2 = vpop.f32.mrb[32].mxu0 }
 0xb23   : > { %2336 = vst.msk [vmem:[%s622_s28 + $0x38] sm:$0xff] %vm723_vm0, %v2999_v2  ;;  %v2320_v27 = vpop.f32.mrb[33].mxu0 }
 0xb24   : > { %2335 = vst.msk [vmem:[%s622_s28 + $0x30] sm:$0xff] %vm723_vm0, %v2320_v27 }
 0xb25 PF: > { %s29_s0 = sadd.s32 1, %s3279_s0  }
 0xb26   : > { %p26_p4 = scmp.ge.s32.totalorder %s29_s0, 4  }
 0xb28   :  { %28 = sbr.rel (!%p26_p4) target bundleno = 5 (0x5), region = 129 }

</bundles_post_ra>
